<compile_context>
chip_gen: v5e
topology: v5e:2x2
jax: 0.10.0
libtpu: 0.0.40
codegen_flags: <defaults>
</compile_context>

<pallas_src>
import jax
import jax.numpy as jnp
from jax import lax
from jax.experimental import pallas as pl
from jax.experimental.pallas import tpu as pltpu


def _make_fused_kernel(num_layers, seq_len, batch, batch_pad, hidden):
    """Builds the fused (LSTM stack + ReLU + FC) kernel for static shapes."""
    L, T, B, Bp, H = num_layers, seq_len, batch, batch_pad, hidden
    f32 = jnp.float32

    def kernel(*refs):
        # Ref order: inputs [x2d, (wih, whh, bias) * L, wfc, bfc],
        #            outputs [out],
        #            scratch [seq_a, seq_b, xp, hfin].
        x_ref = refs[0]
        wih = [refs[1 + 3 * l] for l in range(L)]
        whh = [refs[2 + 3 * l] for l in range(L)]
        bias = [refs[3 + 3 * l] for l in range(L)]
        wfc_ref = refs[1 + 3 * L]
        bfc_ref = refs[2 + 3 * L]
        out_ref = refs[3 + 3 * L]
        seq_a, seq_b, xp_scr, hfin_scr = refs[4 + 3 * L:8 + 3 * L]

        for l in range(L):
            src = x_ref if l == 0 else (seq_a if l % 2 == 1 else seq_b)
            dst = seq_a if l % 2 == 0 else seq_b
            last_layer = (l == L - 1)

            # Hoisted input projection: ONE (T*Bp, Din_l) @ (Din_l, 4H) matmul
            # covering all timesteps, bias folded in, one lane-dense store.
            # Entirely off the serial per-timestep dependency chain.
            xp_scr[...] = (
                jnp.dot(src[...], wih[l][...], preferred_element_type=f32)
                + bias[l][...])

            whh_l = whh[l][...]                                 # (H, 4H)

            # ---- t = 0 peeled: h = c = 0 -> no recurrent matmul, no f*c term.
            pre0 = xp_scr[pl.ds(0, Bp), :]                      # (Bp, 4H): i|f|g|o
            sig0 = jax.nn.sigmoid(pre0)
            g0 = jnp.tanh(pre0[:, 2 * H:3 * H])
            c0 = sig0[:, :H] * g0
            h0 = sig0[:, 3 * H:] * jnp.tanh(c0)
            if not last_layer:
                dst[pl.ds(0, Bp), :] = h0

            # ---- t = 1 .. T-1: one fused matmul + one full-width sigmoid pass,
            # h/c carried in registers (no VMEM round trip on the serial chain).
            def step(t, carry):
                h, c = carry
                r0 = pl.multiple_of(t * Bp, Bp)                 # aligned row slab
                pre = xp_scr[pl.ds(r0, Bp), :] + jnp.dot(
                    h, whh_l, preferred_element_type=f32)       # (Bp, 4H)
                sig = jax.nn.sigmoid(pre)
                g_t = jnp.tanh(pre[:, 2 * H:3 * H])
                c_new = sig[:, H:2 * H] * c + sig[:, :H] * g_t
                h_new = sig[:, 3 * H:] * jnp.tanh(c_new)
                if not last_layer:      # last layer: only h_n is consumed below
                    dst[pl.ds(r0, Bp), :] = h_new
                return (h_new, c_new)

            h_fin, _ = lax.fori_loop(1, T, step, (h0, c0), unroll=True)
            hfin_scr[l] = h_fin                                 # final h of layer l

        # FC head: out = relu(h_out.view(-1, L*H)) @ W_fc^T + b_fc, done as ONE
        # matmul + ONE store. Row r, lane chunk j of the flattened PyTorch view
        # maps to h_out[(r*L + j) // B, (r*L + j) % B, :] (faithful interleave).
        hf = [hfin_scr[l] for l in range(L)]                    # each (Bp, H)
        rows = []
        for r in range(B):
            chunks = []
            for j in range(L):
                q = r * L + j
                l_idx, b_idx = q // B, q % B
                chunks.append(hf[l_idx][b_idx:b_idx + 1, :])    # (1, H)
            rows.append(jnp.concatenate(chunks, axis=-1))       # (1, L*H)
        h_flat = jnp.concatenate(rows, axis=0)                  # (B, L*H)
        out_ref[...] = (
            jnp.dot(jnp.maximum(h_flat, 0.0), wfc_ref[...],
                    preferred_element_type=f32)
            + bfc_ref[...])

    return kernel


class LSTMModelPallas:
    """Pallas re-implementation of the PyTorch LSTMModel forward pass."""

    def __init__(self, input_size, output_size, hidden_size, num_layers, key):
        self.input_size = input_size
        self.output_size = output_size
        self.hidden_size = hidden_size
        self.num_layers = num_layers

        H = hidden_size
        scale = 1.0 / (H ** 0.5)          # PyTorch default U(-1/sqrt(H), 1/sqrt(H))
        keys = jax.random.split(key, 4 * num_layers + 2)

        # Gate-fused, pre-transposed weights, built once (not per forward call):
        #   wih_cat: (Din_l, 4H), whh_cat: (H, 4H), bias_cat: (1, 4H)
        # with the 4H lane axis in PyTorch gate order (i, f, g, o).
        self.wih_cat, self.whh_cat, self.bias_cat = [], [], []
        k = 0
        for layer in range(num_layers):
            din = input_size if layer == 0 else H
            w_ih = jax.random.uniform(keys[k], (4 * H, din), minval=-scale, maxval=scale); k += 1
            w_hh = jax.random.uniform(keys[k], (4 * H, H), minval=-scale, maxval=scale); k += 1
            b_ih = jax.random.uniform(keys[k], (4 * H,), minval=-scale, maxval=scale); k += 1
            b_hh = jax.random.uniform(keys[k], (4 * H,), minval=-scale, maxval=scale); k += 1
            self.wih_cat.append(jnp.transpose(w_ih))                  # (din, 4H)
            self.whh_cat.append(jnp.transpose(w_hh))                  # (H, 4H)
            self.bias_cat.append((b_ih + b_hh).reshape(1, 4 * H))     # (1, 4H)

        fc_in = H * num_layers
        fc_scale = 1.0 / (fc_in ** 0.5)
        w_fc = jax.random.uniform(keys[k], (output_size, fc_in),
                                  minval=-fc_scale, maxval=fc_scale); k += 1
        b_fc = jax.random.uniform(keys[k], (output_size,),
                                  minval=-fc_scale, maxval=fc_scale)
        self.wfc = jnp.transpose(w_fc)                                # (L*H, Dout)
        self.bfc = b_fc.reshape(1, output_size)

        self._jit_forward = jax.jit(self._forward)

    def _forward(self, x):
        x = x.astype(jnp.float32)
        B, T, Din = x.shape
        H, L, Dout = self.hidden_size, self.num_layers, self.output_size
        Bp = max(8, ((B + 7) // 8) * 8)   # pad batch (sublane dim) to a multiple of 8

        # Time-major, batch-padded, flattened rows (row index = t*Bp + b). Glue
        # only; padded rows are zeros and never read back for the real output.
        xt = jnp.transpose(x, (1, 0, 2))                        # (T, B, Din)
        xt = jnp.pad(xt, ((0, 0), (0, Bp - B), (0, 0)))         # (T, Bp, Din)
        x2d = xt.reshape(T * Bp, Din)

        in_specs = [pl.BlockSpec((T * Bp, Din), lambda i: (0, 0))]
        args = [x2d]
        for l in range(L):
            din_l = Din if l == 0 else H
            in_specs += [pl.BlockSpec((din_l, 4 * H), lambda i: (0, 0)),
                         pl.BlockSpec((H, 4 * H), lambda i: (0, 0)),
                         pl.BlockSpec((1, 4 * H), lambda i: (0, 0))]
            args += [self.wih_cat[l], self.whh_cat[l], self.bias_cat[l]]
        in_specs += [pl.BlockSpec((L * H, Dout), lambda i: (0, 0)),
                     pl.BlockSpec((1, Dout), lambda i: (0, 0))]
        args += [self.wfc, self.bfc]

        kernel = _make_fused_kernel(L, T, B, Bp, H)

        # TODO(synk): for large T/H, chunk the time axis of the hoisted projection
        # (xp/seq scratch grows ~6*T*Bp*H*4B and hits v7x's 64 MiB VMEM first) and
        # make batch a parallel grid axis so the second TensorCore is used.
        return pl.pallas_call(
            kernel,
            out_shape=jax.ShapeDtypeStruct((B, Dout), jnp.float32),
            grid=(1,),
            in_specs=in_specs,
            out_specs=pl.BlockSpec((B, Dout), lambda i: (0, 0)),
            scratch_shapes=[
                pltpu.VMEM((T * Bp, H), jnp.float32),      # inter-layer seq (ping)
                pltpu.VMEM((T * Bp, H), jnp.float32),      # inter-layer seq (pong)
                pltpu.VMEM((T * Bp, 4 * H), jnp.float32),  # fused gate x-projection
                pltpu.VMEM((L, Bp, H), jnp.float32),       # final h per layer (h_n)
            ],
            compiler_params=pltpu.CompilerParams(
                dimension_semantics=("arbitrary",)),
        )(*args)

    def __call__(self, x):
        return self._jit_forward(x)


def reference_forward(model, x):
    """Pure-JAX (non-Pallas) reference of the same forward pass, for verification."""
    x = x.astype(jnp.float32)
    B, T, _ = x.shape
    H, L = model.hidden_size, model.num_layers
    seq = jnp.transpose(x, (1, 0, 2))                           # (T, B, Din)
    finals = []
    for l in range(L):
        wih, whh, b = model.wih_cat[l], model.whh_cat[l], model.bias_cat[l]
        h = jnp.zeros((B, H), jnp.float32)
        c = jnp.zeros((B, H), jnp.float32)
        outs = []
        for t in range(T):
            pre = seq[t] @ wih + b + h @ whh                    # (B, 4H): i|f|g|o
            i_t = jax.nn.sigmoid(pre[:, :H])
            f_t = jax.nn.sigmoid(pre[:, H:2 * H])
            g_t = jnp.tanh(pre[:, 2 * H:3 * H])
            o_t = jax.nn.sigmoid(pre[:, 3 * H:])
            c = f_t * c + i_t * g_t
            h = o_t * jnp.tanh(c)
            outs.append(h)
        seq = jnp.stack(outs, axis=0)
        finals.append(h)
    h_out = jnp.stack(finals, axis=0)                           # (L, B, H) == h_n
    h_flat = h_out.reshape(-1, L * H)                           # PyTorch .view interleave
    return jnp.maximum(h_flat, 0.0) @ model.wfc + model.bfc


if __name__ == "__main__":
    BATCH, SEQ, INPUT_SIZE = 2, 8, 16
    HIDDEN, NUM_LAYERS, OUTPUT_SIZE = 32, 2, 4

    key = jax.random.PRNGKey(0)
    k_param, k_x = jax.random.split(key)

    model = LSTMModelPallas(INPUT_SIZE, OUTPUT_SIZE, HIDDEN, NUM_LAYERS, k_param)
    x = jax.random.normal(k_x, (BATCH, SEQ, INPUT_SIZE), dtype=jnp.float32)

    out = model(x)
    jax.block_until_ready(out)
    assert out.shape == (BATCH, OUTPUT_SIZE), out.shape

    # Correctness check against a pure-JAX reference (loose tolerance: MXU default
    # f32 matmul precision differs slightly from the XLA reference path).
    ref = reference_forward(model, x)
    max_err = float(jnp.max(jnp.abs(out - ref)))
    assert max_err < 2e-2, f"kernel/reference mismatch: max_err={max_err}"

    print("KERNEL_OK")
</pallas_src>

<mosaic_0001>
module attributes {stable_mosaic.version = 11 : i64} {
  func.func @kernel(%arg0: i32, %arg1: memref<64x16xf32, #tpu.memory_space<vmem>>, %arg2: memref<16x128xf32, #tpu.memory_space<vmem>>, %arg3: memref<32x128xf32, #tpu.memory_space<vmem>>, %arg4: memref<1x128xf32, #tpu.memory_space<vmem>>, %arg5: memref<32x128xf32, #tpu.memory_space<vmem>>, %arg6: memref<32x128xf32, #tpu.memory_space<vmem>>, %arg7: memref<1x128xf32, #tpu.memory_space<vmem>>, %arg8: memref<64x4xf32, #tpu.memory_space<vmem>>, %arg9: memref<1x4xf32, #tpu.memory_space<vmem>>, %arg10: memref<2x4xf32, #tpu.memory_space<vmem>>, %arg11: memref<64x32xf32, #tpu.memory_space<vmem>>, %arg12: memref<64x32xf32, #tpu.memory_space<vmem>>, %arg13: memref<64x128xf32, #tpu.memory_space<vmem>>, %arg14: memref<2x8x32xf32, #tpu.memory_space<vmem>>) attributes {dimension_semantics = [#tpu.dimension_semantics<arbitrary>], iteration_bounds = array<i64: 1>, scalar_prefetch = 0 : i64, scratch_operands = 4 : i64, tpu.core_type = #tpu.core_type<tc>, window_params = [{pipeline_mode = #tpu.pipeline_mode<synchronous>, transform_indices = @transform_0, window_bounds = array<i64: 64, 16>}, {pipeline_mode = #tpu.pipeline_mode<synchronous>, transform_indices = @transform_1, window_bounds = array<i64: 16, 128>}, {pipeline_mode = #tpu.pipeline_mode<synchronous>, transform_indices = @transform_2, window_bounds = array<i64: 32, 128>}, {pipeline_mode = #tpu.pipeline_mode<synchronous>, transform_indices = @transform_3, window_bounds = array<i64: 1, 128>}, {pipeline_mode = #tpu.pipeline_mode<synchronous>, transform_indices = @transform_4, window_bounds = array<i64: 32, 128>}, {pipeline_mode = #tpu.pipeline_mode<synchronous>, transform_indices = @transform_5, window_bounds = array<i64: 32, 128>}, {pipeline_mode = #tpu.pipeline_mode<synchronous>, transform_indices = @transform_6, window_bounds = array<i64: 1, 128>}, {pipeline_mode = #tpu.pipeline_mode<synchronous>, transform_indices = @transform_7, window_bounds = array<i64: 64, 4>}, {pipeline_mode = #tpu.pipeline_mode<synchronous>, transform_indices = @transform_8, window_bounds = array<i64: 1, 4>}, {pipeline_mode = #tpu.pipeline_mode<synchronous>, transform_indices = @transform_9, window_bounds = array<i64: 2, 4>}]} {
    %c0 = arith.constant 0 : index
    %c0_0 = arith.constant 0 : index
    %0 = vector.load %arg1[%c0, %c0_0] : memref<64x16xf32, #tpu.memory_space<vmem>>, vector<64x16xf32>
    %c0_1 = arith.constant 0 : index
    %c0_2 = arith.constant 0 : index
    %1 = vector.load %arg2[%c0_1, %c0_2] : memref<16x128xf32, #tpu.memory_space<vmem>>, vector<16x128xf32>
    %cst = arith.constant dense<0.000000e+00> : vector<64x128xf32>
    %2 = tpu.matmul %0, %1, %cst {dimension_numbers = #tpu.dot_dimension_numbers<[1], [0], [0], [1], [0, 0, 1, 1], [], []>} : vector<64x16xf32>, vector<16x128xf32>, vector<64x128xf32> -> vector<64x128xf32>
    %c0_3 = arith.constant 0 : index
    %c0_4 = arith.constant 0 : index
    %3 = vector.load %arg4[%c0_3, %c0_4] : memref<1x128xf32, #tpu.memory_space<vmem>>, vector<1x128xf32>
    %4 = vector.broadcast %3 : vector<1x128xf32> to vector<64x128xf32>
    %5 = arith.addf %2, %4 : vector<64x128xf32>
    %c0_5 = arith.constant 0 : index
    %c0_6 = arith.constant 0 : index
    %6 = vector.load %arg13[%c0_5, %c0_6] : memref<64x128xf32, #tpu.memory_space<vmem>>, vector<64x128xf32>
    tpu.vector_store %arg13[%c0_5, %c0_6], %5 {strides = array<i32>} : memref<64x128xf32, #tpu.memory_space<vmem>>, vector<64x128xf32>,
    %c0_7 = arith.constant 0 : index
    %c0_8 = arith.constant 0 : index
    %7 = vector.load %arg3[%c0_7, %c0_8] : memref<32x128xf32, #tpu.memory_space<vmem>>, vector<32x128xf32>
    %c0_9 = arith.constant 0 : index
    %c0_10 = arith.constant 0 : index
    %8 = vector.load %arg13[%c0_9, %c0_10] : memref<64x128xf32, #tpu.memory_space<vmem>>, vector<8x128xf32>
    %9 = arith.negf %8 : vector<8x128xf32>
    %10 = math.exp %9 : vector<8x128xf32>
    %cst_11 = arith.constant 1.000000e+00 : f32
    %11 = vector.broadcast %cst_11 : f32 to vector<8x128xf32>
    %12 = arith.addf %11, %10 : vector<8x128xf32>
    %13 = arith.divf %11, %12 : vector<8x128xf32>
    %14 = vector.extract_strided_slice %8 {offsets = [0, 64], sizes = [8, 32], strides = [1, 1]} : vector<8x128xf32> to vector<8x32xf32>
    %15 = math.tanh %14 : vector<8x32xf32>
    %16 = vector.extract_strided_slice %13 {offsets = [0, 0], sizes = [8, 32], strides = [1, 1]} : vector<8x128xf32> to vector<8x32xf32>
    %17 = arith.mulf %16, %15 : vector<8x32xf32>
    %18 = vector.extract_strided_slice %13 {offsets = [0, 96], sizes = [8, 32], strides = [1, 1]} : vector<8x128xf32> to vector<8x32xf32>
    %19 = math.tanh %17 : vector<8x32xf32>
    %20 = arith.mulf %18, %19 : vector<8x32xf32>
    %c0_12 = arith.constant 0 : index
    %c0_13 = arith.constant 0 : index
    %21 = vector.load %arg11[%c0_12, %c0_13] : memref<64x32xf32, #tpu.memory_space<vmem>>, vector<8x32xf32>
    tpu.vector_store %arg11[%c0_12, %c0_13], %20 {strides = array<i32>} : memref<64x32xf32, #tpu.memory_space<vmem>>, vector<8x32xf32>,
    %c1_i32 = arith.constant 1 : i32
    %c8_i32 = arith.constant 8 : i32
    %22 = arith.muli %c1_i32, %c8_i32 : i32
    %23 = tpu.assume_multiple %22, 8 : i32
    %24 = arith.index_cast %23 : i32 to index
    %c0_14 = arith.constant 0 : index
    %25 = vector.load %arg13[%24, %c0_14] : memref<64x128xf32, #tpu.memory_space<vmem>>, vector<8x128xf32>
    %cst_15 = arith.constant dense<0.000000e+00> : vector<8x128xf32>
    %26 = tpu.matmul %20, %7, %cst_15 {dimension_numbers = #tpu.dot_dimension_numbers<[1], [0], [0], [1], [0, 0, 1, 1], [], []>} : vector<8x32xf32>, vector<32x128xf32>, vector<8x128xf32> -> vector<8x128xf32>
    %27 = arith.addf %25, %26 : vector<8x128xf32>
    %28 = arith.negf %27 : vector<8x128xf32>
    %29 = math.exp %28 : vector<8x128xf32>
    %cst_16 = arith.constant 1.000000e+00 : f32
    %30 = vector.broadcast %cst_16 : f32 to vector<8x128xf32>
    %31 = arith.addf %30, %29 : vector<8x128xf32>
    %32 = arith.divf %30, %31 : vector<8x128xf32>
    %33 = vector.extract_strided_slice %27 {offsets = [0, 64], sizes = [8, 32], strides = [1, 1]} : vector<8x128xf32> to vector<8x32xf32>
    %34 = math.tanh %33 : vector<8x32xf32>
    %35 = vector.extract_strided_slice %32 {offsets = [0, 32], sizes = [8, 32], strides = [1, 1]} : vector<8x128xf32> to vector<8x32xf32>
    %36 = arith.mulf %35, %17 : vector<8x32xf32>
    %37 = vector.extract_strided_slice %32 {offsets = [0, 0], sizes = [8, 32], strides = [1, 1]} : vector<8x128xf32> to vector<8x32xf32>
    %38 = arith.mulf %37, %34 : vector<8x32xf32>
    %39 = arith.addf %36, %38 : vector<8x32xf32>
    %40 = vector.extract_strided_slice %32 {offsets = [0, 96], sizes = [8, 32], strides = [1, 1]} : vector<8x128xf32> to vector<8x32xf32>
    %41 = math.tanh %39 : vector<8x32xf32>
    %42 = arith.mulf %40, %41 : vector<8x32xf32>
    %43 = arith.index_cast %23 : i32 to index
    %c0_17 = arith.constant 0 : index
    %44 = vector.load %arg11[%43, %c0_17] : memref<64x32xf32, #tpu.memory_space<vmem>>, vector<8x32xf32>
    tpu.vector_store %arg11[%43, %c0_17], %42 {strides = array<i32>} : memref<64x32xf32, #tpu.memory_space<vmem>>, vector<8x32xf32>,
    %c2_i32 = arith.constant 2 : i32
    %c8_i32_18 = arith.constant 8 : i32
    %45 = arith.muli %c2_i32, %c8_i32_18 : i32
    %46 = tpu.assume_multiple %45, 8 : i32
    %47 = arith.index_cast %46 : i32 to index
    %c0_19 = arith.constant 0 : index
    %48 = vector.load %arg13[%47, %c0_19] : memref<64x128xf32, #tpu.memory_space<vmem>>, vector<8x128xf32>
    %cst_20 = arith.constant dense<0.000000e+00> : vector<8x128xf32>
    %49 = tpu.matmul %42, %7, %cst_20 {dimension_numbers = #tpu.dot_dimension_numbers<[1], [0], [0], [1], [0, 0, 1, 1], [], []>} : vector<8x32xf32>, vector<32x128xf32>, vector<8x128xf32> -> vector<8x128xf32>
    %50 = arith.addf %48, %49 : vector<8x128xf32>
    %51 = arith.negf %50 : vector<8x128xf32>
    %52 = math.exp %51 : vector<8x128xf32>
    %cst_21 = arith.constant 1.000000e+00 : f32
    %53 = vector.broadcast %cst_21 : f32 to vector<8x128xf32>
    %54 = arith.addf %53, %52 : vector<8x128xf32>
    %55 = arith.divf %53, %54 : vector<8x128xf32>
    %56 = vector.extract_strided_slice %50 {offsets = [0, 64], sizes = [8, 32], strides = [1, 1]} : vector<8x128xf32> to vector<8x32xf32>
    %57 = math.tanh %56 : vector<8x32xf32>
    %58 = vector.extract_strided_slice %55 {offsets = [0, 32], sizes = [8, 32], strides = [1, 1]} : vector<8x128xf32> to vector<8x32xf32>
    %59 = arith.mulf %58, %39 : vector<8x32xf32>
    %60 = vector.extract_strided_slice %55 {offsets = [0, 0], sizes = [8, 32], strides = [1, 1]} : vector<8x128xf32> to vector<8x32xf32>
    %61 = arith.mulf %60, %57 : vector<8x32xf32>
    %62 = arith.addf %59, %61 : vector<8x32xf32>
    %63 = vector.extract_strided_slice %55 {offsets = [0, 96], sizes = [8, 32], strides = [1, 1]} : vector<8x128xf32> to vector<8x32xf32>
    %64 = math.tanh %62 : vector<8x32xf32>
    %65 = arith.mulf %63, %64 : vector<8x32xf32>
    %66 = arith.index_cast %46 : i32 to index
    %c0_22 = arith.constant 0 : index
    %67 = vector.load %arg11[%66, %c0_22] : memref<64x32xf32, #tpu.memory_space<vmem>>, vector<8x32xf32>
    tpu.vector_store %arg11[%66, %c0_22], %65 {strides = array<i32>} : memref<64x32xf32, #tpu.memory_space<vmem>>, vector<8x32xf32>,
    %c3_i32 = arith.constant 3 : i32
    %c8_i32_23 = arith.constant 8 : i32
    %68 = arith.muli %c3_i32, %c8_i32_23 : i32
    %69 = tpu.assume_multiple %68, 8 : i32
    %70 = arith.index_cast %69 : i32 to index
    %c0_24 = arith.constant 0 : index
    %71 = vector.load %arg13[%70, %c0_24] : memref<64x128xf32, #tpu.memory_space<vmem>>, vector<8x128xf32>
    %cst_25 = arith.constant dense<0.000000e+00> : vector<8x128xf32>
    %72 = tpu.matmul %65, %7, %cst_25 {dimension_numbers = #tpu.dot_dimension_numbers<[1], [0], [0], [1], [0, 0, 1, 1], [], []>} : vector<8x32xf32>, vector<32x128xf32>, vector<8x128xf32> -> vector<8x128xf32>
    %73 = arith.addf %71, %72 : vector<8x128xf32>
    %74 = arith.negf %73 : vector<8x128xf32>
    %75 = math.exp %74 : vector<8x128xf32>
    %cst_26 = arith.constant 1.000000e+00 : f32
    %76 = vector.broadcast %cst_26 : f32 to vector<8x128xf32>
    %77 = arith.addf %76, %75 : vector<8x128xf32>
    %78 = arith.divf %76, %77 : vector<8x128xf32>
    %79 = vector.extract_strided_slice %73 {offsets = [0, 64], sizes = [8, 32], strides = [1, 1]} : vector<8x128xf32> to vector<8x32xf32>
    %80 = math.tanh %79 : vector<8x32xf32>
    %81 = vector.extract_strided_slice %78 {offsets = [0, 32], sizes = [8, 32], strides = [1, 1]} : vector<8x128xf32> to vector<8x32xf32>
    %82 = arith.mulf %81, %62 : vector<8x32xf32>
    %83 = vector.extract_strided_slice %78 {offsets = [0, 0], sizes = [8, 32], strides = [1, 1]} : vector<8x128xf32> to vector<8x32xf32>
    %84 = arith.mulf %83, %80 : vector<8x32xf32>
    %85 = arith.addf %82, %84 : vector<8x32xf32>
    %86 = vector.extract_strided_slice %78 {offsets = [0, 96], sizes = [8, 32], strides = [1, 1]} : vector<8x128xf32> to vector<8x32xf32>
    %87 = math.tanh %85 : vector<8x32xf32>
    %88 = arith.mulf %86, %87 : vector<8x32xf32>
    %89 = arith.index_cast %69 : i32 to index
    %c0_27 = arith.constant 0 : index
    %90 = vector.load %arg11[%89, %c0_27] : memref<64x32xf32, #tpu.memory_space<vmem>>, vector<8x32xf32>
    tpu.vector_store %arg11[%89, %c0_27], %88 {strides = array<i32>} : memref<64x32xf32, #tpu.memory_space<vmem>>, vector<8x32xf32>,
    %c4_i32 = arith.constant 4 : i32
    %c8_i32_28 = arith.constant 8 : i32
    %91 = arith.muli %c4_i32, %c8_i32_28 : i32
    %92 = tpu.assume_multiple %91, 8 : i32
    %93 = arith.index_cast %92 : i32 to index
    %c0_29 = arith.constant 0 : index
    %94 = vector.load %arg13[%93, %c0_29] : memref<64x128xf32, #tpu.memory_space<vmem>>, vector<8x128xf32>
    %cst_30 = arith.constant dense<0.000000e+00> : vector<8x128xf32>
    %95 = tpu.matmul %88, %7, %cst_30 {dimension_numbers = #tpu.dot_dimension_numbers<[1], [0], [0], [1], [0, 0, 1, 1], [], []>} : vector<8x32xf32>, vector<32x128xf32>, vector<8x128xf32> -> vector<8x128xf32>
    %96 = arith.addf %94, %95 : vector<8x128xf32>
    %97 = arith.negf %96 : vector<8x128xf32>
    %98 = math.exp %97 : vector<8x128xf32>
    %cst_31 = arith.constant 1.000000e+00 : f32
    %99 = vector.broadcast %cst_31 : f32 to vector<8x128xf32>
    %100 = arith.addf %99, %98 : vector<8x128xf32>
    %101 = arith.divf %99, %100 : vector<8x128xf32>
    %102 = vector.extract_strided_slice %96 {offsets = [0, 64], sizes = [8, 32], strides = [1, 1]} : vector<8x128xf32> to vector<8x32xf32>
    %103 = math.tanh %102 : vector<8x32xf32>
    %104 = vector.extract_strided_slice %101 {offsets = [0, 32], sizes = [8, 32], strides = [1, 1]} : vector<8x128xf32> to vector<8x32xf32>
    %105 = arith.mulf %104, %85 : vector<8x32xf32>
    %106 = vector.extract_strided_slice %101 {offsets = [0, 0], sizes = [8, 32], strides = [1, 1]} : vector<8x128xf32> to vector<8x32xf32>
    %107 = arith.mulf %106, %103 : vector<8x32xf32>
    %108 = arith.addf %105, %107 : vector<8x32xf32>
    %109 = vector.extract_strided_slice %101 {offsets = [0, 96], sizes = [8, 32], strides = [1, 1]} : vector<8x128xf32> to vector<8x32xf32>
    %110 = math.tanh %108 : vector<8x32xf32>
    %111 = arith.mulf %109, %110 : vector<8x32xf32>
    %112 = arith.index_cast %92 : i32 to index
    %c0_32 = arith.constant 0 : index
    %113 = vector.load %arg11[%112, %c0_32] : memref<64x32xf32, #tpu.memory_space<vmem>>, vector<8x32xf32>
    tpu.vector_store %arg11[%112, %c0_32], %111 {strides = array<i32>} : memref<64x32xf32, #tpu.memory_space<vmem>>, vector<8x32xf32>,
    %c5_i32 = arith.constant 5 : i32
    %c8_i32_33 = arith.constant 8 : i32
    %114 = arith.muli %c5_i32, %c8_i32_33 : i32
    %115 = tpu.assume_multiple %114, 8 : i32
    %116 = arith.index_cast %115 : i32 to index
    %c0_34 = arith.constant 0 : index
    %117 = vector.load %arg13[%116, %c0_34] : memref<64x128xf32, #tpu.memory_space<vmem>>, vector<8x128xf32>
    %cst_35 = arith.constant dense<0.000000e+00> : vector<8x128xf32>
    %118 = tpu.matmul %111, %7, %cst_35 {dimension_numbers = #tpu.dot_dimension_numbers<[1], [0], [0], [1], [0, 0, 1, 1], [], []>} : vector<8x32xf32>, vector<32x128xf32>, vector<8x128xf32> -> vector<8x128xf32>
    %119 = arith.addf %117, %118 : vector<8x128xf32>
    %120 = arith.negf %119 : vector<8x128xf32>
    %121 = math.exp %120 : vector<8x128xf32>
    %cst_36 = arith.constant 1.000000e+00 : f32
    %122 = vector.broadcast %cst_36 : f32 to vector<8x128xf32>
    %123 = arith.addf %122, %121 : vector<8x128xf32>
    %124 = arith.divf %122, %123 : vector<8x128xf32>
    %125 = vector.extract_strided_slice %119 {offsets = [0, 64], sizes = [8, 32], strides = [1, 1]} : vector<8x128xf32> to vector<8x32xf32>
    %126 = math.tanh %125 : vector<8x32xf32>
    %127 = vector.extract_strided_slice %124 {offsets = [0, 32], sizes = [8, 32], strides = [1, 1]} : vector<8x128xf32> to vector<8x32xf32>
    %128 = arith.mulf %127, %108 : vector<8x32xf32>
    %129 = vector.extract_strided_slice %124 {offsets = [0, 0], sizes = [8, 32], strides = [1, 1]} : vector<8x128xf32> to vector<8x32xf32>
    %130 = arith.mulf %129, %126 : vector<8x32xf32>
    %131 = arith.addf %128, %130 : vector<8x32xf32>
    %132 = vector.extract_strided_slice %124 {offsets = [0, 96], sizes = [8, 32], strides = [1, 1]} : vector<8x128xf32> to vector<8x32xf32>
    %133 = math.tanh %131 : vector<8x32xf32>
    %134 = arith.mulf %132, %133 : vector<8x32xf32>
    %135 = arith.index_cast %115 : i32 to index
    %c0_37 = arith.constant 0 : index
    %136 = vector.load %arg11[%135, %c0_37] : memref<64x32xf32, #tpu.memory_space<vmem>>, vector<8x32xf32>
    tpu.vector_store %arg11[%135, %c0_37], %134 {strides = array<i32>} : memref<64x32xf32, #tpu.memory_space<vmem>>, vector<8x32xf32>,
    %c6_i32 = arith.constant 6 : i32
    %c8_i32_38 = arith.constant 8 : i32
    %137 = arith.muli %c6_i32, %c8_i32_38 : i32
    %138 = tpu.assume_multiple %137, 8 : i32
    %139 = arith.index_cast %138 : i32 to index
    %c0_39 = arith.constant 0 : index
    %140 = vector.load %arg13[%139, %c0_39] : memref<64x128xf32, #tpu.memory_space<vmem>>, vector<8x128xf32>
    %cst_40 = arith.constant dense<0.000000e+00> : vector<8x128xf32>
    %141 = tpu.matmul %134, %7, %cst_40 {dimension_numbers = #tpu.dot_dimension_numbers<[1], [0], [0], [1], [0, 0, 1, 1], [], []>} : vector<8x32xf32>, vector<32x128xf32>, vector<8x128xf32> -> vector<8x128xf32>
    %142 = arith.addf %140, %141 : vector<8x128xf32>
    %143 = arith.negf %142 : vector<8x128xf32>
    %144 = math.exp %143 : vector<8x128xf32>
    %cst_41 = arith.constant 1.000000e+00 : f32
    %145 = vector.broadcast %cst_41 : f32 to vector<8x128xf32>
    %146 = arith.addf %145, %144 : vector<8x128xf32>
    %147 = arith.divf %145, %146 : vector<8x128xf32>
    %148 = vector.extract_strided_slice %142 {offsets = [0, 64], sizes = [8, 32], strides = [1, 1]} : vector<8x128xf32> to vector<8x32xf32>
    %149 = math.tanh %148 : vector<8x32xf32>
    %150 = vector.extract_strided_slice %147 {offsets = [0, 32], sizes = [8, 32], strides = [1, 1]} : vector<8x128xf32> to vector<8x32xf32>
    %151 = arith.mulf %150, %131 : vector<8x32xf32>
    %152 = vector.extract_strided_slice %147 {offsets = [0, 0], sizes = [8, 32], strides = [1, 1]} : vector<8x128xf32> to vector<8x32xf32>
    %153 = arith.mulf %152, %149 : vector<8x32xf32>
    %154 = arith.addf %151, %153 : vector<8x32xf32>
    %155 = vector.extract_strided_slice %147 {offsets = [0, 96], sizes = [8, 32], strides = [1, 1]} : vector<8x128xf32> to vector<8x32xf32>
    %156 = math.tanh %154 : vector<8x32xf32>
    %157 = arith.mulf %155, %156 : vector<8x32xf32>
    %158 = arith.index_cast %138 : i32 to index
    %c0_42 = arith.constant 0 : index
    %159 = vector.load %arg11[%158, %c0_42] : memref<64x32xf32, #tpu.memory_space<vmem>>, vector<8x32xf32>
    tpu.vector_store %arg11[%158, %c0_42], %157 {strides = array<i32>} : memref<64x32xf32, #tpu.memory_space<vmem>>, vector<8x32xf32>,
    %c7_i32 = arith.constant 7 : i32
    %c8_i32_43 = arith.constant 8 : i32
    %160 = arith.muli %c7_i32, %c8_i32_43 : i32
    %161 = tpu.assume_multiple %160, 8 : i32
    %162 = arith.index_cast %161 : i32 to index
    %c0_44 = arith.constant 0 : index
    %163 = vector.load %arg13[%162, %c0_44] : memref<64x128xf32, #tpu.memory_space<vmem>>, vector<8x128xf32>
    %cst_45 = arith.constant dense<0.000000e+00> : vector<8x128xf32>
    %164 = tpu.matmul %157, %7, %cst_45 {dimension_numbers = #tpu.dot_dimension_numbers<[1], [0], [0], [1], [0, 0, 1, 1], [], []>} : vector<8x32xf32>, vector<32x128xf32>, vector<8x128xf32> -> vector<8x128xf32>
    %165 = arith.addf %163, %164 : vector<8x128xf32>
    %166 = arith.negf %165 : vector<8x128xf32>
    %167 = math.exp %166 : vector<8x128xf32>
    %cst_46 = arith.constant 1.000000e+00 : f32
    %168 = vector.broadcast %cst_46 : f32 to vector<8x128xf32>
    %169 = arith.addf %168, %167 : vector<8x128xf32>
    %170 = arith.divf %168, %169 : vector<8x128xf32>
    %171 = vector.extract_strided_slice %165 {offsets = [0, 64], sizes = [8, 32], strides = [1, 1]} : vector<8x128xf32> to vector<8x32xf32>
    %172 = math.tanh %171 : vector<8x32xf32>
    %173 = vector.extract_strided_slice %170 {offsets = [0, 32], sizes = [8, 32], strides = [1, 1]} : vector<8x128xf32> to vector<8x32xf32>
    %174 = arith.mulf %173, %154 : vector<8x32xf32>
    %175 = vector.extract_strided_slice %170 {offsets = [0, 0], sizes = [8, 32], strides = [1, 1]} : vector<8x128xf32> to vector<8x32xf32>
    %176 = arith.mulf %175, %172 : vector<8x32xf32>
    %177 = arith.addf %174, %176 : vector<8x32xf32>
    %178 = vector.extract_strided_slice %170 {offsets = [0, 96], sizes = [8, 32], strides = [1, 1]} : vector<8x128xf32> to vector<8x32xf32>
    %179 = math.tanh %177 : vector<8x32xf32>
    %180 = arith.mulf %178, %179 : vector<8x32xf32>
    %181 = arith.index_cast %161 : i32 to index
    %c0_47 = arith.constant 0 : index
    %182 = vector.load %arg11[%181, %c0_47] : memref<64x32xf32, #tpu.memory_space<vmem>>, vector<8x32xf32>
    tpu.vector_store %arg11[%181, %c0_47], %180 {strides = array<i32>} : memref<64x32xf32, #tpu.memory_space<vmem>>, vector<8x32xf32>,
    %c7_i32_48 = arith.constant 7 : i32
    %c0_49 = arith.constant 0 : index
    %c0_50 = arith.constant 0 : index
    %c0_51 = arith.constant 0 : index
    %183 = vector.load %arg14[%c0_49, %c0_50, %c0_51] : memref<2x8x32xf32, #tpu.memory_space<vmem>>, vector<1x8x32xf32>
    %184 = vector.shape_cast %183 : vector<1x8x32xf32> to vector<8x32xf32>
    %185 = vector.shape_cast %180 : vector<8x32xf32> to vector<1x8x32xf32>
    tpu.vector_store %arg14[%c0_49, %c0_50, %c0_51], %185 {strides = array<i32>} : memref<2x8x32xf32, #tpu.memory_space<vmem>>, vector<1x8x32xf32>,
    %c0_52 = arith.constant 0 : index
    %c0_53 = arith.constant 0 : index
    %186 = vector.load %arg11[%c0_52, %c0_53] : memref<64x32xf32, #tpu.memory_space<vmem>>, vector<64x32xf32>
    %c0_54 = arith.constant 0 : index
    %c0_55 = arith.constant 0 : index
    %187 = vector.load %arg5[%c0_54, %c0_55] : memref<32x128xf32, #tpu.memory_space<vmem>>, vector<32x128xf32>
    %cst_56 = arith.constant dense<0.000000e+00> : vector<64x128xf32>
    %188 = tpu.matmul %186, %187, %cst_56 {dimension_numbers = #tpu.dot_dimension_numbers<[1], [0], [0], [1], [0, 0, 1, 1], [], []>} : vector<64x32xf32>, vector<32x128xf32>, vector<64x128xf32> -> vector<64x128xf32>
    %c0_57 = arith.constant 0 : index
    %c0_58 = arith.constant 0 : index
    %189 = vector.load %arg7[%c0_57, %c0_58] : memref<1x128xf32, #tpu.memory_space<vmem>>, vector<1x128xf32>
    %190 = vector.broadcast %189 : vector<1x128xf32> to vector<64x128xf32>
    %191 = arith.addf %188, %190 : vector<64x128xf32>
    %c0_59 = arith.constant 0 : index
    %c0_60 = arith.constant 0 : index
    %192 = vector.load %arg13[%c0_59, %c0_60] : memref<64x128xf32, #tpu.memory_space<vmem>>, vector<64x128xf32>
    tpu.vector_store %arg13[%c0_59, %c0_60], %191 {strides = array<i32>} : memref<64x128xf32, #tpu.memory_space<vmem>>, vector<64x128xf32>,
    %c0_61 = arith.constant 0 : index
    %c0_62 = arith.constant 0 : index
    %193 = vector.load %arg6[%c0_61, %c0_62] : memref<32x128xf32, #tpu.memory_space<vmem>>, vector<32x128xf32>
    %c0_63 = arith.constant 0 : index
    %c0_64 = arith.constant 0 : index
    %194 = vector.load %arg13[%c0_63, %c0_64] : memref<64x128xf32, #tpu.memory_space<vmem>>, vector<8x128xf32>
    %195 = arith.negf %194 : vector<8x128xf32>
    %196 = math.exp %195 : vector<8x128xf32>
    %cst_65 = arith.constant 1.000000e+00 : f32
    %197 = vector.broadcast %cst_65 : f32 to vector<8x128xf32>
    %198 = arith.addf %197, %196 : vector<8x128xf32>
    %199 = arith.divf %197, %198 : vector<8x128xf32>
    %200 = vector.extract_strided_slice %194 {offsets = [0, 64], sizes = [8, 32], strides = [1, 1]} : vector<8x128xf32> to vector<8x32xf32>
    %201 = math.tanh %200 : vector<8x32xf32>
    %202 = vector.extract_strided_slice %199 {offsets = [0, 0], sizes = [8, 32], strides = [1, 1]} : vector<8x128xf32> to vector<8x32xf32>
    %203 = arith.mulf %202, %201 : vector<8x32xf32>
    %204 = vector.extract_strided_slice %199 {offsets = [0, 96], sizes = [8, 32], strides = [1, 1]} : vector<8x128xf32> to vector<8x32xf32>
    %205 = math.tanh %203 : vector<8x32xf32>
    %206 = arith.mulf %204, %205 : vector<8x32xf32>
    %c1_i32_66 = arith.constant 1 : i32
    %c8_i32_67 = arith.constant 8 : i32
    %207 = arith.muli %c1_i32_66, %c8_i32_67 : i32
    %208 = tpu.assume_multiple %207, 8 : i32
    %209 = arith.index_cast %208 : i32 to index
    %c0_68 = arith.constant 0 : index
    %210 = vector.load %arg13[%209, %c0_68] : memref<64x128xf32, #tpu.memory_space<vmem>>, vector<8x128xf32>
    %cst_69 = arith.constant dense<0.000000e+00> : vector<8x128xf32>
    %211 = tpu.matmul %206, %193, %cst_69 {dimension_numbers = #tpu.dot_dimension_numbers<[1], [0], [0], [1], [0, 0, 1, 1], [], []>} : vector<8x32xf32>, vector<32x128xf32>, vector<8x128xf32> -> vector<8x128xf32>
    %212 = arith.addf %210, %211 : vector<8x128xf32>
    %213 = arith.negf %212 : vector<8x128xf32>
    %214 = math.exp %213 : vector<8x128xf32>
    %cst_70 = arith.constant 1.000000e+00 : f32
    %215 = vector.broadcast %cst_70 : f32 to vector<8x128xf32>
    %216 = arith.addf %215, %214 : vector<8x128xf32>
    %217 = arith.divf %215, %216 : vector<8x128xf32>
    %218 = vector.extract_strided_slice %212 {offsets = [0, 64], sizes = [8, 32], strides = [1, 1]} : vector<8x128xf32> to vector<8x32xf32>
    %219 = math.tanh %218 : vector<8x32xf32>
    %220 = vector.extract_strided_slice %217 {offsets = [0, 32], sizes = [8, 32], strides = [1, 1]} : vector<8x128xf32> to vector<8x32xf32>
    %221 = arith.mulf %220, %203 : vector<8x32xf32>
    %222 = vector.extract_strided_slice %217 {offsets = [0, 0], sizes = [8, 32], strides = [1, 1]} : vector<8x128xf32> to vector<8x32xf32>
    %223 = arith.mulf %222, %219 : vector<8x32xf32>
    %224 = arith.addf %221, %223 : vector<8x32xf32>
    %225 = vector.extract_strided_slice %217 {offsets = [0, 96], sizes = [8, 32], strides = [1, 1]} : vector<8x128xf32> to vector<8x32xf32>
    %226 = math.tanh %224 : vector<8x32xf32>
    %227 = arith.mulf %225, %226 : vector<8x32xf32>
    %c2_i32_71 = arith.constant 2 : i32
    %c8_i32_72 = arith.constant 8 : i32
    %228 = arith.muli %c2_i32_71, %c8_i32_72 : i32
    %229 = tpu.assume_multiple %228, 8 : i32
    %230 = arith.index_cast %229 : i32 to index
    %c0_73 = arith.constant 0 : index
    %231 = vector.load %arg13[%230, %c0_73] : memref<64x128xf32, #tpu.memory_space<vmem>>, vector<8x128xf32>
    %cst_74 = arith.constant dense<0.000000e+00> : vector<8x128xf32>
    %232 = tpu.matmul %227, %193, %cst_74 {dimension_numbers = #tpu.dot_dimension_numbers<[1], [0], [0], [1], [0, 0, 1, 1], [], []>} : vector<8x32xf32>, vector<32x128xf32>, vector<8x128xf32> -> vector<8x128xf32>
    %233 = arith.addf %231, %232 : vector<8x128xf32>
    %234 = arith.negf %233 : vector<8x128xf32>
    %235 = math.exp %234 : vector<8x128xf32>
    %cst_75 = arith.constant 1.000000e+00 : f32
    %236 = vector.broadcast %cst_75 : f32 to vector<8x128xf32>
    %237 = arith.addf %236, %235 : vector<8x128xf32>
    %238 = arith.divf %236, %237 : vector<8x128xf32>
    %239 = vector.extract_strided_slice %233 {offsets = [0, 64], sizes = [8, 32], strides = [1, 1]} : vector<8x128xf32> to vector<8x32xf32>
    %240 = math.tanh %239 : vector<8x32xf32>
    %241 = vector.extract_strided_slice %238 {offsets = [0, 32], sizes = [8, 32], strides = [1, 1]} : vector<8x128xf32> to vector<8x32xf32>
    %242 = arith.mulf %241, %224 : vector<8x32xf32>
    %243 = vector.extract_strided_slice %238 {offsets = [0, 0], sizes = [8, 32], strides = [1, 1]} : vector<8x128xf32> to vector<8x32xf32>
    %244 = arith.mulf %243, %240 : vector<8x32xf32>
    %245 = arith.addf %242, %244 : vector<8x32xf32>
    %246 = vector.extract_strided_slice %238 {offsets = [0, 96], sizes = [8, 32], strides = [1, 1]} : vector<8x128xf32> to vector<8x32xf32>
    %247 = math.tanh %245 : vector<8x32xf32>
    %248 = arith.mulf %246, %247 : vector<8x32xf32>
    %c3_i32_76 = arith.constant 3 : i32
    %c8_i32_77 = arith.constant 8 : i32
    %249 = arith.muli %c3_i32_76, %c8_i32_77 : i32
    %250 = tpu.assume_multiple %249, 8 : i32
    %251 = arith.index_cast %250 : i32 to index
    %c0_78 = arith.constant 0 : index
    %252 = vector.load %arg13[%251, %c0_78] : memref<64x128xf32, #tpu.memory_space<vmem>>, vector<8x128xf32>
    %cst_79 = arith.constant dense<0.000000e+00> : vector<8x128xf32>
    %253 = tpu.matmul %248, %193, %cst_79 {dimension_numbers = #tpu.dot_dimension_numbers<[1], [0], [0], [1], [0, 0, 1, 1], [], []>} : vector<8x32xf32>, vector<32x128xf32>, vector<8x128xf32> -> vector<8x128xf32>
    %254 = arith.addf %252, %253 : vector<8x128xf32>
    %255 = arith.negf %254 : vector<8x128xf32>
    %256 = math.exp %255 : vector<8x128xf32>
    %cst_80 = arith.constant 1.000000e+00 : f32
    %257 = vector.broadcast %cst_80 : f32 to vector<8x128xf32>
    %258 = arith.addf %257, %256 : vector<8x128xf32>
    %259 = arith.divf %257, %258 : vector<8x128xf32>
    %260 = vector.extract_strided_slice %254 {offsets = [0, 64], sizes = [8, 32], strides = [1, 1]} : vector<8x128xf32> to vector<8x32xf32>
    %261 = math.tanh %260 : vector<8x32xf32>
    %262 = vector.extract_strided_slice %259 {offsets = [0, 32], sizes = [8, 32], strides = [1, 1]} : vector<8x128xf32> to vector<8x32xf32>
    %263 = arith.mulf %262, %245 : vector<8x32xf32>
    %264 = vector.extract_strided_slice %259 {offsets = [0, 0], sizes = [8, 32], strides = [1, 1]} : vector<8x128xf32> to vector<8x32xf32>
    %265 = arith.mulf %264, %261 : vector<8x32xf32>
    %266 = arith.addf %263, %265 : vector<8x32xf32>
    %267 = vector.extract_strided_slice %259 {offsets = [0, 96], sizes = [8, 32], strides = [1, 1]} : vector<8x128xf32> to vector<8x32xf32>
    %268 = math.tanh %266 : vector<8x32xf32>
    %269 = arith.mulf %267, %268 : vector<8x32xf32>
    %c4_i32_81 = arith.constant 4 : i32
    %c8_i32_82 = arith.constant 8 : i32
    %270 = arith.muli %c4_i32_81, %c8_i32_82 : i32
    %271 = tpu.assume_multiple %270, 8 : i32
    %272 = arith.index_cast %271 : i32 to index
    %c0_83 = arith.constant 0 : index
    %273 = vector.load %arg13[%272, %c0_83] : memref<64x128xf32, #tpu.memory_space<vmem>>, vector<8x128xf32>
    %cst_84 = arith.constant dense<0.000000e+00> : vector<8x128xf32>
    %274 = tpu.matmul %269, %193, %cst_84 {dimension_numbers = #tpu.dot_dimension_numbers<[1], [0], [0], [1], [0, 0, 1, 1], [], []>} : vector<8x32xf32>, vector<32x128xf32>, vector<8x128xf32> -> vector<8x128xf32>
    %275 = arith.addf %273, %274 : vector<8x128xf32>
    %276 = arith.negf %275 : vector<8x128xf32>
    %277 = math.exp %276 : vector<8x128xf32>
    %cst_85 = arith.constant 1.000000e+00 : f32
    %278 = vector.broadcast %cst_85 : f32 to vector<8x128xf32>
    %279 = arith.addf %278, %277 : vector<8x128xf32>
    %280 = arith.divf %278, %279 : vector<8x128xf32>
    %281 = vector.extract_strided_slice %275 {offsets = [0, 64], sizes = [8, 32], strides = [1, 1]} : vector<8x128xf32> to vector<8x32xf32>
    %282 = math.tanh %281 : vector<8x32xf32>
    %283 = vector.extract_strided_slice %280 {offsets = [0, 32], sizes = [8, 32], strides = [1, 1]} : vector<8x128xf32> to vector<8x32xf32>
    %284 = arith.mulf %283, %266 : vector<8x32xf32>
    %285 = vector.extract_strided_slice %280 {offsets = [0, 0], sizes = [8, 32], strides = [1, 1]} : vector<8x128xf32> to vector<8x32xf32>
    %286 = arith.mulf %285, %282 : vector<8x32xf32>
    %287 = arith.addf %284, %286 : vector<8x32xf32>
    %288 = vector.extract_strided_slice %280 {offsets = [0, 96], sizes = [8, 32], strides = [1, 1]} : vector<8x128xf32> to vector<8x32xf32>
    %289 = math.tanh %287 : vector<8x32xf32>
    %290 = arith.mulf %288, %289 : vector<8x32xf32>
    %c5_i32_86 = arith.constant 5 : i32
    %c8_i32_87 = arith.constant 8 : i32
    %291 = arith.muli %c5_i32_86, %c8_i32_87 : i32
    %292 = tpu.assume_multiple %291, 8 : i32
    %293 = arith.index_cast %292 : i32 to index
    %c0_88 = arith.constant 0 : index
    %294 = vector.load %arg13[%293, %c0_88] : memref<64x128xf32, #tpu.memory_space<vmem>>, vector<8x128xf32>
    %cst_89 = arith.constant dense<0.000000e+00> : vector<8x128xf32>
    %295 = tpu.matmul %290, %193, %cst_89 {dimension_numbers = #tpu.dot_dimension_numbers<[1], [0], [0], [1], [0, 0, 1, 1], [], []>} : vector<8x32xf32>, vector<32x128xf32>, vector<8x128xf32> -> vector<8x128xf32>
    %296 = arith.addf %294, %295 : vector<8x128xf32>
    %297 = arith.negf %296 : vector<8x128xf32>
    %298 = math.exp %297 : vector<8x128xf32>
    %cst_90 = arith.constant 1.000000e+00 : f32
    %299 = vector.broadcast %cst_90 : f32 to vector<8x128xf32>
    %300 = arith.addf %299, %298 : vector<8x128xf32>
    %301 = arith.divf %299, %300 : vector<8x128xf32>
    %302 = vector.extract_strided_slice %296 {offsets = [0, 64], sizes = [8, 32], strides = [1, 1]} : vector<8x128xf32> to vector<8x32xf32>
    %303 = math.tanh %302 : vector<8x32xf32>
    %304 = vector.extract_strided_slice %301 {offsets = [0, 32], sizes = [8, 32], strides = [1, 1]} : vector<8x128xf32> to vector<8x32xf32>
    %305 = arith.mulf %304, %287 : vector<8x32xf32>
    %306 = vector.extract_strided_slice %301 {offsets = [0, 0], sizes = [8, 32], strides = [1, 1]} : vector<8x128xf32> to vector<8x32xf32>
    %307 = arith.mulf %306, %303 : vector<8x32xf32>
    %308 = arith.addf %305, %307 : vector<8x32xf32>
    %309 = vector.extract_strided_slice %301 {offsets = [0, 96], sizes = [8, 32], strides = [1, 1]} : vector<8x128xf32> to vector<8x32xf32>
    %310 = math.tanh %308 : vector<8x32xf32>
    %311 = arith.mulf %309, %310 : vector<8x32xf32>
    %c6_i32_91 = arith.constant 6 : i32
    %c8_i32_92 = arith.constant 8 : i32
    %312 = arith.muli %c6_i32_91, %c8_i32_92 : i32
    %313 = tpu.assume_multiple %312, 8 : i32
    %314 = arith.index_cast %313 : i32 to index
    %c0_93 = arith.constant 0 : index
    %315 = vector.load %arg13[%314, %c0_93] : memref<64x128xf32, #tpu.memory_space<vmem>>, vector<8x128xf32>
    %cst_94 = arith.constant dense<0.000000e+00> : vector<8x128xf32>
    %316 = tpu.matmul %311, %193, %cst_94 {dimension_numbers = #tpu.dot_dimension_numbers<[1], [0], [0], [1], [0, 0, 1, 1], [], []>} : vector<8x32xf32>, vector<32x128xf32>, vector<8x128xf32> -> vector<8x128xf32>
    %317 = arith.addf %315, %316 : vector<8x128xf32>
    %318 = arith.negf %317 : vector<8x128xf32>
    %319 = math.exp %318 : vector<8x128xf32>
    %cst_95 = arith.constant 1.000000e+00 : f32
    %320 = vector.broadcast %cst_95 : f32 to vector<8x128xf32>
    %321 = arith.addf %320, %319 : vector<8x128xf32>
    %322 = arith.divf %320, %321 : vector<8x128xf32>
    %323 = vector.extract_strided_slice %317 {offsets = [0, 64], sizes = [8, 32], strides = [1, 1]} : vector<8x128xf32> to vector<8x32xf32>
    %324 = math.tanh %323 : vector<8x32xf32>
    %325 = vector.extract_strided_slice %322 {offsets = [0, 32], sizes = [8, 32], strides = [1, 1]} : vector<8x128xf32> to vector<8x32xf32>
    %326 = arith.mulf %325, %308 : vector<8x32xf32>
    %327 = vector.extract_strided_slice %322 {offsets = [0, 0], sizes = [8, 32], strides = [1, 1]} : vector<8x128xf32> to vector<8x32xf32>
    %328 = arith.mulf %327, %324 : vector<8x32xf32>
    %329 = arith.addf %326, %328 : vector<8x32xf32>
    %330 = vector.extract_strided_slice %322 {offsets = [0, 96], sizes = [8, 32], strides = [1, 1]} : vector<8x128xf32> to vector<8x32xf32>
    %331 = math.tanh %329 : vector<8x32xf32>
    %332 = arith.mulf %330, %331 : vector<8x32xf32>
    %c7_i32_96 = arith.constant 7 : i32
    %c8_i32_97 = arith.constant 8 : i32
    %333 = arith.muli %c7_i32_96, %c8_i32_97 : i32
    %334 = tpu.assume_multiple %333, 8 : i32
    %335 = arith.index_cast %334 : i32 to index
    %c0_98 = arith.constant 0 : index
    %336 = vector.load %arg13[%335, %c0_98] : memref<64x128xf32, #tpu.memory_space<vmem>>, vector<8x128xf32>
    %cst_99 = arith.constant dense<0.000000e+00> : vector<8x128xf32>
    %337 = tpu.matmul %332, %193, %cst_99 {dimension_numbers = #tpu.dot_dimension_numbers<[1], [0], [0], [1], [0, 0, 1, 1], [], []>} : vector<8x32xf32>, vector<32x128xf32>, vector<8x128xf32> -> vector<8x128xf32>
    %338 = arith.addf %336, %337 : vector<8x128xf32>
    %339 = arith.negf %338 : vector<8x128xf32>
    %340 = math.exp %339 : vector<8x128xf32>
    %cst_100 = arith.constant 1.000000e+00 : f32
    %341 = vector.broadcast %cst_100 : f32 to vector<8x128xf32>
    %342 = arith.addf %341, %340 : vector<8x128xf32>
    %343 = arith.divf %341, %342 : vector<8x128xf32>
    %344 = vector.extract_strided_slice %338 {offsets = [0, 64], sizes = [8, 32], strides = [1, 1]} : vector<8x128xf32> to vector<8x32xf32>
    %345 = math.tanh %344 : vector<8x32xf32>
    %346 = vector.extract_strided_slice %343 {offsets = [0, 32], sizes = [8, 32], strides = [1, 1]} : vector<8x128xf32> to vector<8x32xf32>
    %347 = arith.mulf %346, %329 : vector<8x32xf32>
    %348 = vector.extract_strided_slice %343 {offsets = [0, 0], sizes = [8, 32], strides = [1, 1]} : vector<8x128xf32> to vector<8x32xf32>
    %349 = arith.mulf %348, %345 : vector<8x32xf32>
    %350 = arith.addf %347, %349 : vector<8x32xf32>
    %351 = vector.extract_strided_slice %343 {offsets = [0, 96], sizes = [8, 32], strides = [1, 1]} : vector<8x128xf32> to vector<8x32xf32>
    %352 = math.tanh %350 : vector<8x32xf32>
    %353 = arith.mulf %351, %352 : vector<8x32xf32>
    %c7_i32_101 = arith.constant 7 : i32
    %c1 = arith.constant 1 : index
    %c0_102 = arith.constant 0 : index
    %c0_103 = arith.constant 0 : index
    %354 = vector.load %arg14[%c1, %c0_102, %c0_103] : memref<2x8x32xf32, #tpu.memory_space<vmem>>, vector<1x8x32xf32>
    %355 = vector.shape_cast %354 : vector<1x8x32xf32> to vector<8x32xf32>
    %356 = vector.shape_cast %353 : vector<8x32xf32> to vector<1x8x32xf32>
    tpu.vector_store %arg14[%c1, %c0_102, %c0_103], %356 {strides = array<i32>} : memref<2x8x32xf32, #tpu.memory_space<vmem>>, vector<1x8x32xf32>,
    %c0_104 = arith.constant 0 : index
    %c0_105 = arith.constant 0 : index
    %c0_106 = arith.constant 0 : index
    %357 = vector.load %arg14[%c0_104, %c0_105, %c0_106] : memref<2x8x32xf32, #tpu.memory_space<vmem>>, vector<1x8x32xf32>
    %358 = vector.shape_cast %357 : vector<1x8x32xf32> to vector<8x32xf32>
    %c1_107 = arith.constant 1 : index
    %c0_108 = arith.constant 0 : index
    %c0_109 = arith.constant 0 : index
    %359 = vector.load %arg14[%c1_107, %c0_108, %c0_109] : memref<2x8x32xf32, #tpu.memory_space<vmem>>, vector<1x8x32xf32>
    %360 = vector.shape_cast %359 : vector<1x8x32xf32> to vector<8x32xf32>
    %361 = vector.extract_strided_slice %358 {offsets = [0, 0], sizes = [1, 32], strides = [1, 1]} : vector<8x32xf32> to vector<1x32xf32>
    %362 = vector.extract_strided_slice %358 {offsets = [1, 0], sizes = [1, 32], strides = [1, 1]} : vector<8x32xf32> to vector<1x32xf32>
    %363 = tpu.concatenate %361, %362 in 1 : vector<1x32xf32>, vector<1x32xf32> -> vector<1x64xf32>
    %364 = vector.extract_strided_slice %360 {offsets = [0, 0], sizes = [1, 32], strides = [1, 1]} : vector<8x32xf32> to vector<1x32xf32>
    %365 = vector.extract_strided_slice %360 {offsets = [1, 0], sizes = [1, 32], strides = [1, 1]} : vector<8x32xf32> to vector<1x32xf32>
    %366 = tpu.concatenate %364, %365 in 1 : vector<1x32xf32>, vector<1x32xf32> -> vector<1x64xf32>
    %367 = tpu.concatenate %363, %366 in 0 : vector<1x64xf32>, vector<1x64xf32> -> vector<2x64xf32>
    %cst_110 = arith.constant 0.000000e+00 : f32
    %368 = vector.broadcast %cst_110 : f32 to vector<2x64xf32>
    %369 = arith.maximumf %367, %368 : vector<2x64xf32>
    %c0_111 = arith.constant 0 : index
    %c0_112 = arith.constant 0 : index
    %370 = vector.load %arg8[%c0_111, %c0_112] : memref<64x4xf32, #tpu.memory_space<vmem>>, vector<64x4xf32>
    %cst_113 = arith.constant dense<0.000000e+00> : vector<2x4xf32>
    %371 = tpu.matmul %369, %370, %cst_113 {dimension_numbers = #tpu.dot_dimension_numbers<[1], [0], [0], [1], [0, 0, 1, 1], [], []>} : vector<2x64xf32>, vector<64x4xf32>, vector<2x4xf32> -> vector<2x4xf32>
    %c0_114 = arith.constant 0 : index
    %c0_115 = arith.constant 0 : index
    %372 = vector.load %arg9[%c0_114, %c0_115] : memref<1x4xf32, #tpu.memory_space<vmem>>, vector<1x4xf32>
    %373 = vector.broadcast %372 : vector<1x4xf32> to vector<2x4xf32>
    %374 = arith.addf %371, %373 : vector<2x4xf32>
    %c0_116 = arith.constant 0 : index
    %c0_117 = arith.constant 0 : index
    %375 = vector.load %arg10[%c0_116, %c0_117] : memref<2x4xf32, #tpu.memory_space<vmem>>, vector<2x4xf32>
    tpu.vector_store %arg10[%c0_116, %c0_117], %374 {strides = array<i32>} : memref<2x4xf32, #tpu.memory_space<vmem>>, vector<2x4xf32>,
    return
  }
  func.func @transform_0(%arg0: i32) -> (i32, i32) {
    %c0_i32 = arith.constant 0 : i32
    %c0_i32_0 = arith.constant 0 : i32
    %c0_i32_1 = arith.constant 0 : i32
    return %c0_i32, %c0_i32_0 : i32, i32
  }
  func.func @transform_1(%arg0: i32) -> (i32, i32) {
    %c0_i32 = arith.constant 0 : i32
    %c0_i32_0 = arith.constant 0 : i32
    %c0_i32_1 = arith.constant 0 : i32
    return %c0_i32, %c0_i32_0 : i32, i32
  }
  func.func @transform_2(%arg0: i32) -> (i32, i32) {
    %c0_i32 = arith.constant 0 : i32
    %c0_i32_0 = arith.constant 0 : i32
    %c0_i32_1 = arith.constant 0 : i32
    return %c0_i32, %c0_i32_0 : i32, i32
  }
  func.func @transform_3(%arg0: i32) -> (i32, i32) {
    %c0_i32 = arith.constant 0 : i32
    %c0_i32_0 = arith.constant 0 : i32
    %c0_i32_1 = arith.constant 0 : i32
    return %c0_i32, %c0_i32_0 : i32, i32
  }
  func.func @transform_4(%arg0: i32) -> (i32, i32) {
    %c0_i32 = arith.constant 0 : i32
    %c0_i32_0 = arith.constant 0 : i32
    %c0_i32_1 = arith.constant 0 : i32
    return %c0_i32, %c0_i32_0 : i32, i32
  }
  func.func @transform_5(%arg0: i32) -> (i32, i32) {
    %c0_i32 = arith.constant 0 : i32
    %c0_i32_0 = arith.constant 0 : i32
    %c0_i32_1 = arith.constant 0 : i32
    return %c0_i32, %c0_i32_0 : i32, i32
  }
  func.func @transform_6(%arg0: i32) -> (i32, i32) {
    %c0_i32 = arith.constant 0 : i32
    %c0_i32_0 = arith.constant 0 : i32
    %c0_i32_1 = arith.constant 0 : i32
    return %c0_i32, %c0_i32_0 : i32, i32
  }
  func.func @transform_7(%arg0: i32) -> (i32, i32) {
    %c0_i32 = arith.constant 0 : i32
    %c0_i32_0 = arith.constant 0 : i32
    %c0_i32_1 = arith.constant 0 : i32
    return %c0_i32, %c0_i32_0 : i32, i32
  }
  func.func @transform_8(%arg0: i32) -> (i32, i32) {
    %c0_i32 = arith.constant 0 : i32
    %c0_i32_0 = arith.constant 0 : i32
    %c0_i32_1 = arith.constant 0 : i32
    return %c0_i32, %c0_i32_0 : i32, i32
  }
  func.func @transform_9(%arg0: i32) -> (i32, i32) {
    %c0_i32 = arith.constant 0 : i32
    %c0_i32_0 = arith.constant 0 : i32
    %c0_i32_1 = arith.constant 0 : i32
    return %c0_i32, %c0_i32_0 : i32, i32
  }
}

</mosaic_0001>

<bundles_post_ra>
// kernel: _forward.1
= control target key start
LH: loop header
LB: loop body
LE: loop exit
PB: predicated region body
PF: predicated region fallthrough
CT: control target
= control target key end

     0   :  { %14 = vsyncpa [#allocation7], 0  ;;  %s1923_s0 = inlined_call_operand.vmem [shape: f32[64,16], index: 0, kind: input, shape index: {}]   ;;  %s1924_s1 = inlined_call_operand.vmem [shape: f32[16,128], index: 1, kind: input, shape index: {}]   ;;  %s1925_s2 = inlined_call_operand.hbm [shape: f32[32,128], index: 2, kind: input, shape index: {}]   ;;  %s1926_s3 = inlined_call_operand.vmem [shape: f32[1,128], index: 3, kind: input, shape index: {}]   ;;  %s1927_s4 = inlined_call_operand.hbm [shape: f32[32,128], index: 4, kind: input, shape index: {}]   ;;  %s1928_s5 = inlined_call_operand.vmem [shape: f32[32,128], index: 5, kind: input, shape index: {}]   ;;  %s1929_s6 = inlined_call_operand.vmem [shape: f32[1,128], index: 6, kind: input, shape index: {}]   ;;  %s1930_s7 = inlined_call_operand.vmem [shape: f32[64,4], index: 7, kind: input, shape index: {}]   ;;  %s1931_s8 = inlined_call_operand.vmem [shape: f32[1,4], index: 8, kind: input, shape index: {}]   ;;  %s1932_s9 = inlined_call_operand.hbm [shape: f32[2,4], index: 9, kind: output, shape index: {}]  }
   0x1   :  { %15 = vsyncpa [#allocation10], 0 }
   0x2   :  { %16 = vsyncpa [#allocation8], 0  ;;  %s25_s11 = sshll.u32 %s1925_s2, 4  ;;  %s1603_s12 = smov [#allocation6]   ;;  %s26_s11 = int_to_ptr.hbm [resolvable:$true] %s25_s11 }
   0x3   :  { %s27_s13 = sshll.u32 %s1603_s12, 4  ;;  %s40_s16 = sshll.u32 %s1927_s4, 4  ;;  %s28_s13 = int_to_ptr.vmem [resolvable:$true] %s27_s13  ;;  %s41_s16 = int_to_ptr.hbm [resolvable:$true] %s40_s16 }
   0x4   :  { %s1604_s17 = smov 128   ;;  %s1605_s18 = smov 8  }
   0x5   :  { %33 = dma.hbm_to_vmem [thread:$0]  %s26_s11, 512, %s28_s13, [#allocation7], %s1604_s17, %s1604_s17, %s1605_s18  }
   0x6   :  { %s1606_s19 = smov [#allocation9]  }
   0x7   :  { %s42_s20 = sshll.u32 %s1606_s19, 4  ;;  %s43_s20 = int_to_ptr.vmem [resolvable:$true] %s42_s20 }
   0x8   :  { %48 = dma.hbm_to_vmem [thread:$0]  %s41_s16, 512, %s43_s20, [#allocation10], %s1604_s17, %s1604_s17, %s1605_s18  }
   0x9   :  { %1597 = dma.done.wait [#allocation7], 512  }
   0xa   :  { %1598 = vsyncadd [#allocation7], 4294966784 }
   0xb   :  { %1599 = dma.done.wait [#allocation10], 512  }
   0xc   :  { %1600 = vsyncadd [#allocation10], 4294966784  ;;  %v74_v0 = vld [vmem:[%s1924_s1 + $0x8] sm:$0xff]  ;;  %v73_v1 = vld [vmem:[%s1924_s1] sm:$0xff]  ;;  %vm79_vm0 = vcmask 130048   ;;  %s1607_s1 = smov 64  }
   0xd   :  { %118 = vmatpush.msra.mxu0 %v74_v0  ;;  %v65_v2 = vld [vmem:[%s1923_s0] sm:$0xff]  ;;  %s1609_s27 = smov 96   ;;  %v156_v23 = vld [vmem:[#allocation6 + $0x18] sm:$0xff]  ;;  %v154_v26 = vld [vmem:[#allocation6 + $0x8] sm:$0xff]  ;;  %vm193_vm5 = vcmask 261120   ;;  %s1610_s2 = smov [#allocation11]  }
   0xe   :  { %v1680_v3 = vld [vmem:[%s1926_s3] ss:$0 sm:$0xff]  ;;  %s1608_s3 = smov 32   ;;  %211 = vmatpush.msra.mxu1 %v156_v23  ;;  %v66_v25 = vld [vmem:[%s1923_s0 + $0x8] sm:$0xff]  ;;  %283 = vmatpush.msra.mxu2 %v156_v23  ;;  %v153_v27 = vld [vmem:[#allocation6] sm:$0xff]  ;;  %s1322_s21 = sshll.u32 %s1610_s2, 4  ;;  %s1323_s21 = int_to_ptr.vmem [resolvable:$true] %s1322_s21 }
   0xf   :  { %119 = vmatpush.msra.mxu0 %v73_v1  ;;  %v155_v24 = vld [vmem:[#allocation6 + $0x10] sm:$0xff]  ;;  %351 = vmatpush.msra.mxu3 %v156_v23  ;;  %v67_v58 = vld [vmem:[%s1923_s0 + $0x10] sm:$0xff] }
  0x10   :  { %1335 = vmatmul.msk.f32.vlgmr.msra.gmra.mxu0 %vm79_vm0, %v65_v2  ;;  %212 = vmatpush.msra.mxu1 %v155_v24 }
  0x11   :  { %284 = vmatpush.msra.mxu2 %v155_v24  ;;  %352 = vmatpush.msra.mxu3 %v155_v24 }
  0x12   :  { %213 = vmatpush.msra.mxu1 %v154_v26 }
  0x13   :  { %285 = vmatpush.msra.mxu2 %v154_v26  ;;  %353 = vmatpush.msra.mxu3 %v154_v26 }
  0x14   :  { %214 = vmatpush.msra.mxu1 %v153_v27 }
  0x15   :  { %286 = vmatpush.msra.mxu2 %v153_v27  ;;  %354 = vmatpush.msra.mxu3 %v153_v27 }
  0x16   :  { %419 = vmatpush.msrb.mxu1 %v156_v23 }
  0x17   :  { %487 = vmatpush.msrb.mxu2 %v156_v23  ;;  %555 = vmatpush.msrb.mxu3 %v156_v23 }
  0x18   :  { %1336 = vmatmul.msk.f32.gmra.mxu0 %vm79_vm0, %v66_v25  ;;  %420 = vmatpush.msrb.mxu1 %v155_v24 }
  0x19   :  { %488 = vmatpush.msrb.mxu2 %v155_v24  ;;  %556 = vmatpush.msrb.mxu3 %v155_v24 }
  0x1a   :  { %421 = vmatpush.msrb.mxu1 %v154_v26 }
  0x1b   :  { %489 = vmatpush.msrb.mxu2 %v154_v26  ;;  %557 = vmatpush.msrb.mxu3 %v154_v26 }
  0x1c   :  { %422 = vmatpush.msrb.mxu1 %v153_v27 }
  0x1d   :  { %490 = vmatpush.msrb.mxu2 %v153_v27  ;;  %558 = vmatpush.msrb.mxu3 %v153_v27 }
  0x20   :  { %1337 = vmatmul.msk.f32.gmra.mxu0 %vm79_vm0, %v67_v58 }
  0x8d   :  { %v121_v4 = vpop.f32.mrf.mxu0 }
  0x8e   :  { %v122_v5 = vadd.f32 %v1680_v3, %v121_v4 }
  0x90   :  { %1397 = vtanh.f32 %v122_v5  ;;  %v1343_v7 = vmul.f32 -1.442695, %v122_v5 }
  0x92   :  { %1399 = vpow2.f32 %v1343_v7 }
  0x95   :  { %v124_v31 = vpop.f32.mrf.mxu0 }
  0x96   :  { %v1398_v6 = vpop.eup %1397  ;;  %v125_v32 = vadd.f32 %v1680_v3, %v124_v31 }
  0x97   :  { %179 = vrot.lane.b32.xlu0 %v1398_v6, %s1607_s1 }
  0x98   :  { %v1400_v8 = vpop.eup %1399 }
  0x99   :  { %v161_v9 = vadd.f32 1.0, %v1400_v8 }
  0x9b   :  { %1401 = vrcp.f32 %v161_v9  ;;  %v173_v15 = vand.u32 2147483648, %v161_v9  ;;  %vm167_vm2 = vweird.f32 %v161_v9  ;;  %v171_v16 = vand.u32 2147483647, %v161_v9 }
  0x9d   :  { %v174_v18 = vor.u32 1.1754944e-38, %v173_v15  ;;  %vm172_vm4 = vcmp.eq.f32.partialorder %v171_v16, 8.507059e+37  ;;  %v127_v60 = vpop.f32.mrf.mxu0 }
  0x9e   :  { %v128_v61 = vadd.f32 %v1680_v3, %v127_v60 }
  0xa1   :  { %v1402_v10 = vpop.eup %1401 }
  0xa2   :  { %v163_v11 = vmul.f32 %v1402_v10, %v161_v9  ;;  %vm168_vm1 = vweird.f32 %v1402_v10 }
  0xa3   :  { %vm169_vm3 = vmor %vm167_vm2, %vm168_vm1 }
  0xa4   :  { %v164_v12 = vsub.f32 1.0, %v163_v11 }
  0xa6   :  { %v165_v13 = vmul.f32 %v1402_v10, %v164_v12 }
  0xa8   :  { %v166_v14 = vadd.f32 %v1402_v10, %v165_v13 }
  0xaa   :  { %v170_v17 = vsel %vm169_vm3, %v1402_v10, %v166_v14 }
  0xab   :  { %v175_v20 = vsel %vm172_vm4, %v174_v18, %v170_v17 }
 0x109   :  { %v180_v19 = vpop.permute.xlu0 %179 }
 0x10a   :  { %v182_v21 = vmul.f32 %v180_v19, %v175_v20 }
 0x10c   :  { %1403 = vtanh.f32 %v182_v21  ;;  %241 = vrot.lane.b32.xlu2 %v182_v21, %s1608_s3 }
 0x112   :  { %v1404_v22 = vpop.eup %1403 }
 0x113   :  { %185 = vrot.lane.b32.xlu0 %v1404_v22, %s1609_s27 }
 0x166   :  { %v242_v51 = vpop.permute.xlu2 %241 }
 0x185   :  { %v186_v28 = vpop.permute.xlu0 %185 }
 0x186   :  { %v188_v29 = vmul.f32 %v186_v28, %v175_v20 }
 0x188   :  { %190 = vrot.lane.b32.xlu1 %v188_v29, %s1608_s3 }
 0x1fa   :  { %v191_v30 = vpop.permute.xlu1 %190 }
 0x1fb   :  { %194 = vst.msk [vmem:[#allocation2] sm:$0xff] %vm193_vm5, %v191_v30  ;;  %1344 = vmatmul.msk.f32.vlgmr.msra.gmra.mxu1 %vm193_vm5, %v191_v30 }
 0x1fc   :  { %623 = vmatpush.msra.mxu1 %v156_v23  ;;  %v68_v23 = vld [vmem:[%s1923_s0 + $0x18] sm:$0xff] }
 0x1fd   :  { %1338 = vmatmul.msk.f32.gmra.mxu0 %vm79_vm0, %v68_v23 }
 0x1fe   :  { %624 = vmatpush.msra.mxu1 %v155_v24 }
 0x200   :  { %625 = vmatpush.msra.mxu1 %v154_v26 }
 0x202   :  { %626 = vmatpush.msra.mxu1 %v153_v27 }
 0x278   :  { %v216_v33 = vpop.f32.mrf.mxu1 }
 0x279   :  { %v219_v34 = vadd.f32 %v216_v33, %v125_v32 }
 0x27a   :  { %v130_v25 = vpop.f32.mrf.mxu0 }
 0x27b   :  { %1405 = vtanh.f32 %v219_v34  ;;  %v1345_v36 = vmul.f32 -1.442695, %v219_v34  ;;  %v131_v26 = vadd.f32 %v1680_v3, %v130_v25 }
 0x27d   :  { %1407 = vpow2.f32 %v1345_v36 }
 0x281   :  { %v1406_v35 = vpop.eup %1405 }
 0x282   :  { %246 = vrot.lane.b32.xlu1 %v1406_v35, %s1607_s1 }
 0x283   :  { %v1408_v37 = vpop.eup %1407 }
 0x284   :  { %v223_v38 = vadd.f32 1.0, %v1408_v37 }
 0x286   :  { %1409 = vrcp.f32 %v223_v38  ;;  %v235_v44 = vand.u32 2147483648, %v223_v38  ;;  %vm229_vm7 = vweird.f32 %v223_v38  ;;  %v233_v45 = vand.u32 2147483647, %v223_v38 }
 0x288   :  { %v236_v47 = vor.u32 1.1754944e-38, %v235_v44  ;;  %vm234_vm9 = vcmp.eq.f32.partialorder %v233_v45, 8.507059e+37 }
 0x28c   :  { %v1410_v39 = vpop.eup %1409 }
 0x28d   :  { %v225_v40 = vmul.f32 %v1410_v39, %v223_v38  ;;  %vm230_vm6 = vweird.f32 %v1410_v39 }
 0x28e   :  { %vm231_vm8 = vmor %vm229_vm7, %vm230_vm6 }
 0x28f   :  { %v226_v41 = vsub.f32 1.0, %v225_v40 }
 0x291   :  { %v227_v42 = vmul.f32 %v1410_v39, %v226_v41 }
 0x293   :  { %v228_v43 = vadd.f32 %v1410_v39, %v227_v42 }
 0x295   :  { %v232_v46 = vsel %vm231_vm8, %v1410_v39, %v228_v43 }
 0x296   :  { %v237_v49 = vsel %vm234_vm9, %v236_v47, %v232_v46 }
 0x297   :  { %v244_v52 = vmul.f32 %v242_v51, %v237_v49 }
 0x2f4   :  { %v247_v48 = vpop.permute.xlu1 %246 }
 0x2f5   :  { %v249_v50 = vmul.f32 %v247_v48, %v237_v49 }
 0x2f7   :  { %251 = vrot.lane.b32.xlu2 %v249_v50, %s1608_s3 }
 0x351   :  { %v252_v53 = vpop.permute.xlu2 %251 }
 0x352   :  { %v254_v54 = vadd.f32 %v252_v53, %v244_v52 }
 0x354   :  { %1411 = vtanh.f32 %v254_v54 }
 0x35a   :  { %v1412_v55 = vpop.eup %1411 }
 0x35b   :  { %257 = vrot.lane.b32.xlu0 %v1412_v55, %s1607_s1 }
 0x3cd   :  { %v258_v56 = vpop.permute.xlu0 %257 }
 0x3ce   :  { %v260_v57 = vmul.f32 %v258_v56, %v237_v49  ;;  %v69_v49 = vld [vmem:[%s1923_s0 + $0x20] sm:$0xff] }
 0x3cf   :  { %1339 = vmatmul.msk.f32.gmra.mxu0 %vm79_vm0, %v69_v49 }
 0x3d0   :  { %262 = vrot.lane.b32.xlu1 %v260_v57, %s1608_s3 }
 0x442   :  { %v263_v59 = vpop.permute.xlu1 %262 }
 0x443   :  { %266 = vst.msk [vmem:[#allocation2 + $0x8] sm:$0xff] %vm193_vm5, %v263_v59  ;;  %1346 = vmatmul.msk.f32.vlgmr.msra.gmra.mxu2 %vm193_vm5, %v263_v59 }
 0x44a   :  { %v677_v23 = vld [vmem:[#allocation2 + $0x8] sm:$0xff] }
 0x44c   :  { %v133_v53 = vpop.f32.mrf.mxu0 }
 0x4c6   :  { %v288_v62 = vpop.f32.mrf.mxu2 }
 0x4c7   :  { %v291_v63 = vadd.f32 %v288_v62, %v128_v61 }
 0x4c9   :  { %1413 = vtanh.f32 %v291_v63  ;;  %v1347_v1 = vmul.f32 -1.442695, %v291_v63 }
 0x4cb   :  { %1415 = vpow2.f32 %v1347_v1 }
 0x4cf   :  { %v1414_v0 = vpop.eup %1413 }
 0x4d0   :  { %314 = vrot.lane.b32.xlu2 %v1414_v0, %s1607_s1 }
 0x4d1   :  { %v1416_v2 = vpop.eup %1415 }
 0x4d2   :  { %v295_v4 = vadd.f32 1.0, %v1416_v2 }
 0x4d4   :  { %1417 = vrcp.f32 %v295_v4  ;;  %v307_v10 = vand.u32 2147483648, %v295_v4  ;;  %vm301_vm11 = vweird.f32 %v295_v4  ;;  %v305_v11 = vand.u32 2147483647, %v295_v4 }
 0x4d6   :  { %v308_v13 = vor.u32 1.1754944e-38, %v307_v10  ;;  %vm306_vm13 = vcmp.eq.f32.partialorder %v305_v11, 8.507059e+37 }
 0x4da   :  { %v1418_v5 = vpop.eup %1417 }
 0x4db   :  { %v297_v6 = vmul.f32 %v1418_v5, %v295_v4  ;;  %vm302_vm10 = vweird.f32 %v1418_v5 }
 0x4dc   :  { %vm303_vm12 = vmor %vm301_vm11, %vm302_vm10 }
 0x4dd   :  { %v298_v7 = vsub.f32 1.0, %v297_v6 }
 0x4df   :  { %v299_v8 = vmul.f32 %v1418_v5, %v298_v7 }
 0x4e1   :  { %v300_v9 = vadd.f32 %v1418_v5, %v299_v8 }
 0x4e3   :  { %v304_v12 = vsel %vm303_vm12, %v1418_v5, %v300_v9 }
 0x4e4   :  { %v309_v15 = vsel %vm306_vm13, %v308_v13, %v304_v12 }
 0x4e5   :  { %v312_v17 = vmul.f32 %v309_v15, %v254_v54  ;;  %v134_v54 = vadd.f32 %v1680_v3, %v133_v53  ;;  %v71_v53 = vld [vmem:[%s1923_s0 + $0x30] sm:$0xff] }
 0x52a   :  { %v315_v14 = vpop.permute.xlu2 %314 }
 0x52b   :  { %v317_v16 = vmul.f32 %v315_v14, %v309_v15 }
 0x52d   :  { %319 = vrot.lane.b32.xlu0 %v317_v16, %s1608_s3  ;;  %v687_v16 = vld [vmem:[#allocation9 + $0x18] sm:$0xff] }
 0x52e   :  { %728 = vmatpush.msra.mxu2 %v687_v16 }
 0x59f   :  { %v320_v18 = vpop.permute.xlu0 %319 }
 0x5a0   :  { %v322_v19 = vadd.f32 %v320_v18, %v312_v17  ;;  %v686_v17 = vld [vmem:[#allocation9 + $0x10] sm:$0xff]  ;;  %v70_v18 = vld [vmem:[%s1923_s0 + $0x28] sm:$0xff] }
 0x5a1   :  { %1340 = vmatmul.msk.f32.gmra.mxu0 %vm79_vm0, %v70_v18  ;;  %729 = vmatpush.msra.mxu2 %v686_v17  ;;  %v1772_v18 = vld [vmem:[%s1929_s6] ss:$0 sm:$0xff]  ;;  %s1324_s6 = sshll.u32 %s1932_s9, 4  ;;  %s1325_s6 = int_to_ptr.hbm [resolvable:$true] %s1324_s6 }
 0x5a2   :  { %1419 = vtanh.f32 %v322_v19 }
 0x5a8   :  { %v1420_v20 = vpop.eup %1419 }
 0x5a9   :  { %325 = vrot.lane.b32.xlu1 %v1420_v20, %s1607_s1  ;;  %v684_v20 = vld [vmem:[#allocation9] sm:$0xff]  ;;  %1341 = vmatmul.msk.f32.gmra.mxu0 %vm79_vm0, %v71_v53 }
 0x61b   :  { %v326_v21 = vpop.permute.xlu1 %325 }
 0x61c   :  { %v328_v22 = vmul.f32 %v326_v21, %v309_v15 }
 0x61e   :  { %330 = vrot.lane.b32.xlu2 %v328_v22, %s1608_s3  ;;  %v676_v22 = vld [vmem:[#allocation2] sm:$0xff] }
 0x678   :  { %v331_v24 = vpop.permute.xlu2 %330 }
 0x679   :  { %334 = vst.msk [vmem:[#allocation2 + $0x10] sm:$0xff] %vm193_vm5, %v331_v24  ;;  %1348 = vmatmul.msk.f32.vlgmr.msra.gmra.mxu3 %vm193_vm5, %v331_v24 }
 0x67a   :  { %1382 = vmatpush.msra.mxu3 %v687_v16 }
 0x67c   :  { %1383 = vmatpush.msra.mxu3 %v686_v17  ;;  %v72_v17 = vld [vmem:[%s1923_s0 + $0x38] sm:$0xff] }
 0x67d   :  { %1342 = vmatmul.msk.f32.gmra.mxu0 %vm79_vm0, %v72_v17 }
 0x680   :  { %v678_v24 = vld [vmem:[#allocation2 + $0x10] sm:$0xff] }
 0x6fc   :  { %v356_v27 = vpop.f32.mrf.mxu3 }
 0x6fd   :  { %v359_v28 = vadd.f32 %v356_v27, %v131_v26  ;;  %v136_v27 = vpop.f32.mrf.mxu0 }
 0x6ff   :  { %1421 = vtanh.f32 %v359_v28  ;;  %v1349_v30 = vmul.f32 -1.442695, %v359_v28  ;;  %v137_v28 = vadd.f32 %v1680_v3, %v136_v27 }
 0x701   :  { %1423 = vpow2.f32 %v1349_v30 }
 0x705   :  { %v1422_v29 = vpop.eup %1421 }
 0x706   :  { %382 = vrot.lane.b32.xlu0 %v1422_v29, %s1607_s1 }
 0x707   :  { %v1424_v31 = vpop.eup %1423 }
 0x708   :  { %v363_v32 = vadd.f32 1.0, %v1424_v31 }
 0x70a   :  { %1425 = vrcp.f32 %v363_v32  ;;  %v375_v38 = vand.u32 2147483648, %v363_v32  ;;  %vm369_vm15 = vweird.f32 %v363_v32  ;;  %v373_v39 = vand.u32 2147483647, %v363_v32 }
 0x70c   :  { %v376_v41 = vor.u32 1.1754944e-38, %v375_v38  ;;  %vm374_vm2 = vcmp.eq.f32.partialorder %v373_v39, 8.507059e+37 }
 0x710   :  { %v1426_v33 = vpop.eup %1425 }
 0x711   :  { %v365_v34 = vmul.f32 %v1426_v33, %v363_v32  ;;  %vm370_vm14 = vweird.f32 %v1426_v33 }
 0x712   :  { %vm371_vm1 = vmor %vm369_vm15, %vm370_vm14 }
 0x713   :  { %v366_v35 = vsub.f32 1.0, %v365_v34 }
 0x715   :  { %v367_v36 = vmul.f32 %v1426_v33, %v366_v35 }
 0x717   :  { %v368_v37 = vadd.f32 %v1426_v33, %v367_v36 }
 0x719   :  { %v372_v40 = vsel %vm371_vm1, %v1426_v33, %v368_v37 }
 0x71a   :  { %v377_v43 = vsel %vm374_vm2, %v376_v41, %v372_v40 }
 0x71b   :  { %v380_v45 = vmul.f32 %v377_v43, %v322_v19  ;;  %v685_v19 = vld [vmem:[#allocation9 + $0x8] sm:$0xff] }
 0x71c   :  { %730 = vmatpush.msra.mxu2 %v685_v19  ;;  %1384 = vmatpush.msra.mxu3 %v685_v19 }
 0x71e   :  { %731 = vmatpush.msra.mxu2 %v684_v20  ;;  %1385 = vmatpush.msra.mxu3 %v684_v20 }
 0x778   :  { %v383_v42 = vpop.permute.xlu0 %382 }
 0x779   :  { %v385_v44 = vmul.f32 %v383_v42, %v377_v43 }
 0x77b   :  { %387 = vrot.lane.b32.xlu1 %v385_v44, %s1608_s3 }
 0x7ed   :  { %v388_v46 = vpop.permute.xlu1 %387 }
 0x7ee   :  { %v390_v47 = vadd.f32 %v388_v46, %v380_v45 }
 0x7f0   :  { %1427 = vtanh.f32 %v390_v47 }
 0x7f6   :  { %v1428_v48 = vpop.eup %1427 }
 0x7f7   :  { %393 = vrot.lane.b32.xlu2 %v1428_v48, %s1607_s1 }
 0x851   :  { %v394_v50 = vpop.permute.xlu2 %393 }
 0x852   :  { %v396_v51 = vmul.f32 %v394_v50, %v377_v43 }
 0x854   :  { %398 = vrot.lane.b32.xlu0 %v396_v51, %s1608_s3 }
 0x8c6   :  { %v399_v52 = vpop.permute.xlu0 %398 }
 0x8c7   :  { %402 = vst.msk [vmem:[#allocation2 + $0x18] sm:$0xff] %vm193_vm5, %v399_v52  ;;  %1350 = vmatmul.msk.f32.vlgmr.msrb.gmra.mxu1 %vm193_vm5, %v399_v52 }
 0x8ce   :  { %v679_v25 = vld [vmem:[#allocation2 + $0x18] sm:$0xff] }
 0x944   :  { %v424_v55 = vpop.f32.mrf.mxu1 }
 0x945   :  { %v427_v56 = vadd.f32 %v424_v55, %v134_v54 }
 0x947   :  { %1429 = vtanh.f32 %v427_v56  ;;  %v1351_v58 = vmul.f32 -1.442695, %v427_v56  ;;  %v139_v56 = vpop.f32.mrf.mxu0 }
 0x949   :  { %1431 = vpow2.f32 %v1351_v58 }
 0x94d   :  { %v1430_v57 = vpop.eup %1429 }
 0x94e   :  { %450 = vrot.lane.b32.xlu1 %v1430_v57, %s1607_s1  ;;  %v140_v57 = vadd.f32 %v1680_v3, %v139_v56 }
 0x94f   :  { %v1432_v59 = vpop.eup %1431 }
 0x950   :  { %v431_v60 = vadd.f32 1.0, %v1432_v59 }
 0x952   :  { %1433 = vrcp.f32 %v431_v60  ;;  %v443_v2 = vand.u32 2147483648, %v431_v60  ;;  %vm437_vm4 = vweird.f32 %v431_v60  ;;  %v441_v4 = vand.u32 2147483647, %v431_v60 }
 0x954   :  { %v444_v6 = vor.u32 1.1754944e-38, %v443_v2  ;;  %vm442_vm7 = vcmp.eq.f32.partialorder %v441_v4, 8.507059e+37 }
 0x958   :  { %v1434_v61 = vpop.eup %1433 }
 0x959   :  { %v433_v62 = vmul.f32 %v1434_v61, %v431_v60  ;;  %vm438_vm3 = vweird.f32 %v1434_v61 }
 0x95a   :  { %vm439_vm6 = vmor %vm437_vm4, %vm438_vm3 }
 0x95b   :  { %v434_v63 = vsub.f32 1.0, %v433_v62 }
 0x95d   :  { %v435_v0 = vmul.f32 %v1434_v61, %v434_v63 }
 0x95f   :  { %v436_v1 = vadd.f32 %v1434_v61, %v435_v0 }
 0x961   :  { %v440_v5 = vsel %vm439_vm6, %v1434_v61, %v436_v1 }
 0x962   :  { %v445_v8 = vsel %vm442_vm7, %v444_v6, %v440_v5 }
 0x963   :  { %v448_v10 = vmul.f32 %v445_v8, %v390_v47 }
 0x9c0   :  { %v451_v7 = vpop.permute.xlu1 %450 }
 0x9c1   :  { %v453_v9 = vmul.f32 %v451_v7, %v445_v8 }
 0x9c3   :  { %455 = vrot.lane.b32.xlu2 %v453_v9, %s1608_s3 }
 0xa1d   :  { %v456_v11 = vpop.permute.xlu2 %455 }
 0xa1e   :  { %v1729_v12 = vadd.f32 %v456_v11, %v448_v10 }
 0xa20   :  { %1435 = vtanh.f32 %v1729_v12 }
 0xa26   :  { %v1436_v13 = vpop.eup %1435 }
 0xa27   :  { %461 = vrot.lane.b32.xlu0 %v1436_v13, %s1607_s1 }
 0xa99   :  { %v462_v14 = vpop.permute.xlu0 %461 }
 0xa9a   :  { %v464_v15 = vmul.f32 %v462_v14, %v445_v8 }
 0xa9c   :  { %466 = vrot.lane.b32.xlu1 %v464_v15, %s1608_s3 }
 0xb0e   :  { %v467_v21 = vpop.permute.xlu1 %466 }
 0xb0f   :  { %470 = vst.msk [vmem:[#allocation2 + $0x20] sm:$0xff] %vm193_vm5, %v467_v21  ;;  %1352 = vmatmul.msk.f32.vlgmr.msrb.gmra.mxu2 %vm193_vm5, %v467_v21 }
 0xb16   :  { %v680_v26 = vld [vmem:[#allocation2 + $0x20] sm:$0xff] }
 0xb17   :  { %1358 = vmatmul.msk.f32.vlgmr.msra.gmra.mxu2 %vm193_vm5, %v676_v22 }
 0xb1f   :  { %1359 = vmatmul.msk.f32.gmra.mxu2 %vm193_vm5, %v677_v23 }
 0xb27   :  { %1360 = vmatmul.msk.f32.gmra.mxu2 %vm193_vm5, %v678_v24 }
 0xb2f   :  { %1361 = vmatmul.msk.f32.gmra.mxu2 %vm193_vm5, %v679_v25 }
 0xb37   :  { %1362 = vmatmul.msk.f32.gmra.mxu2 %vm193_vm5, %v680_v26  ;;  %v142_v26 = vpop.f32.mrf.mxu0 }
 0xb38   :  { %v143_v27 = vadd.f32 %v1680_v3, %v142_v26 }
 0xb92   :  { %v492_v29 = vpop.f32.mrf.mxu2 }
 0xb93   :  { %v495_v30 = vadd.f32 %v492_v29, %v137_v28 }
 0xb95   :  { %1437 = vtanh.f32 %v495_v30  ;;  %v1353_v32 = vmul.f32 -1.442695, %v495_v30 }
 0xb97   :  { %1439 = vpow2.f32 %v1353_v32 }
 0xb9a   :  { %v733_v19 = vpop.f32.mrf.mxu2 }
 0xb9b   :  { %v1438_v31 = vpop.eup %1437  ;;  %v734_v20 = vadd.f32 %v1772_v18, %v733_v19 }
 0xb9c   :  { %518 = vrot.lane.b32.xlu2 %v1438_v31, %s1607_s1 }
 0xb9d   :  { %v1440_v33 = vpop.eup %1439  ;;  %v1366_v31 = vmul.f32 -1.442695, %v734_v20 }
 0xb9e   :  { %v499_v34 = vadd.f32 1.0, %v1440_v33 }
 0xba0   :  { %1441 = vrcp.f32 %v499_v34  ;;  %v511_v40 = vand.u32 2147483648, %v499_v34  ;;  %vm505_vm9 = vweird.f32 %v499_v34  ;;  %v509_v41 = vand.u32 2147483647, %v499_v34 }
 0xba2   :  { %v512_v43 = vor.u32 1.1754944e-38, %v511_v40  ;;  %vm510_vm11 = vcmp.eq.f32.partialorder %v509_v41, 8.507059e+37 }
 0xba6   :  { %v1442_v35 = vpop.eup %1441 }
 0xba7   :  { %v501_v36 = vmul.f32 %v1442_v35, %v499_v34  ;;  %vm506_vm8 = vweird.f32 %v1442_v35 }
 0xba8   :  { %vm507_vm10 = vmor %vm505_vm9, %vm506_vm8 }
 0xba9   :  { %v502_v37 = vsub.f32 1.0, %v501_v36 }
 0xbab   :  { %v503_v38 = vmul.f32 %v1442_v35, %v502_v37 }
 0xbad   :  { %v504_v39 = vadd.f32 %v1442_v35, %v503_v38 }
 0xbaf   :  { %v508_v42 = vsel %vm507_vm10, %v1442_v35, %v504_v39 }
 0xbb0   :  { %v513_v45 = vsel %vm510_vm11, %v512_v43, %v508_v42 }
 0xbb1   :  { %v516_v47 = vmul.f32 %v513_v45, %v1729_v12 }
 0xbf6   :  { %v519_v44 = vpop.permute.xlu2 %518 }
 0xbf7   :  { %v521_v46 = vmul.f32 %v519_v44, %v513_v45 }
 0xbf9   :  { %523 = vrot.lane.b32.xlu0 %v521_v46, %s1608_s3 }
 0xc6b   :  { %v524_v48 = vpop.permute.xlu0 %523 }
 0xc6c   :  { %v526_v49 = vadd.f32 %v524_v48, %v516_v47 }
 0xc6e   :  { %1443 = vtanh.f32 %v526_v49 }
 0xc74   :  { %v1444_v50 = vpop.eup %1443 }
 0xc75   :  { %529 = vrot.lane.b32.xlu1 %v1444_v50, %s1607_s1 }
 0xce7   :  { %v530_v51 = vpop.permute.xlu1 %529 }
 0xce8   :  { %v532_v52 = vmul.f32 %v530_v51, %v513_v45 }
 0xcea   :  { %534 = vrot.lane.b32.xlu2 %v532_v52, %s1608_s3 }
 0xd44   :  { %v535_v54 = vpop.permute.xlu2 %534 }
 0xd45   :  { %538 = vst.msk [vmem:[#allocation2 + $0x28] sm:$0xff] %vm193_vm5, %v535_v54  ;;  %1354 = vmatmul.msk.f32.vlgmr.msrb.gmra.mxu3 %vm193_vm5, %v535_v54 }
 0xd4c   :  { %v681_v55 = vld [vmem:[#allocation2 + $0x28] sm:$0xff] }
 0xd4d   :  { %1363 = vmatmul.msk.f32.gmra.mxu2 %vm193_vm5, %v681_v55 }
 0xdc8   :  { %v560_v58 = vpop.f32.mrf.mxu3 }
 0xdc9   :  { %v563_v59 = vadd.f32 %v560_v58, %v140_v57 }
 0xdcb   :  { %1445 = vtanh.f32 %v563_v59  ;;  %v1355_v61 = vmul.f32 -1.442695, %v563_v59 }
 0xdcd   :  { %1447 = vpow2.f32 %v1355_v61 }
 0xdd1   :  { %v1446_v60 = vpop.eup %1445 }
 0xdd2   :  { %586 = vrot.lane.b32.xlu0 %v1446_v60, %s1607_s1 }
 0xdd3   :  { %v1448_v62 = vpop.eup %1447 }
 0xdd4   :  { %v567_v63 = vadd.f32 1.0, %v1448_v62 }
 0xdd6   :  { %1449 = vrcp.f32 %v567_v63  ;;  %v579_v6 = vand.u32 2147483648, %v567_v63  ;;  %vm573_vm13 = vweird.f32 %v567_v63  ;;  %v577_v7 = vand.u32 2147483647, %v567_v63 }
 0xdd8   :  { %v580_v9 = vor.u32 1.1754944e-38, %v579_v6  ;;  %vm578_vm15 = vcmp.eq.f32.partialorder %v577_v7, 8.507059e+37  ;;  %v1792_v6 = vld [vmem:[%s1928_s5 + $0x18] sm:$0xff]  ;;  %v1797_v7 = vld [vmem:[%s1928_s5 + $0x10] sm:$0xff] }
 0xdd9   :  { %819 = vmatpush.msrb.mxu3 %v1792_v6  ;;  %887 = vmatpush.msrb.mxu1 %v1792_v6 }
 0xddb   :  { %820 = vmatpush.msrb.mxu3 %v1797_v7  ;;  %888 = vmatpush.msrb.mxu1 %v1797_v7 }
 0xddc   :  { %v1450_v0 = vpop.eup %1449 }
 0xddd   :  { %v569_v1 = vmul.f32 %v1450_v0, %v567_v63  ;;  %vm574_vm12 = vweird.f32 %v1450_v0 }
 0xdde   :  { %vm575_vm14 = vmor %vm573_vm13, %vm574_vm12 }
 0xddf   :  { %v570_v2 = vsub.f32 1.0, %v569_v1 }
 0xde1   :  { %v571_v4 = vmul.f32 %v1450_v0, %v570_v2 }
 0xde3   :  { %v572_v5 = vadd.f32 %v1450_v0, %v571_v4 }
 0xde5   :  { %v576_v8 = vsel %vm575_vm14, %v1450_v0, %v572_v5 }
 0xde6   :  { %v581_v11 = vsel %vm578_vm15, %v580_v9, %v576_v8  ;;  %v1806_v8 = vld [vmem:[%s1928_s5 + $0x8] sm:$0xff]  ;;  %v1811_v9 = vld [vmem:[%s1928_s5] sm:$0xff] }
 0xde7   :  { %v584_v13 = vmul.f32 %v581_v11, %v526_v49  ;;  %821 = vmatpush.msrb.mxu3 %v1806_v8  ;;  %889 = vmatpush.msrb.mxu1 %v1806_v8 }
 0xde9   :  { %822 = vmatpush.msrb.mxu3 %v1811_v9  ;;  %890 = vmatpush.msrb.mxu1 %v1811_v9 }
 0xe44   :  { %v587_v10 = vpop.permute.xlu0 %586 }
 0xe45   :  { %v589_v12 = vmul.f32 %v587_v10, %v581_v11 }
 0xe47   :  { %591 = vrot.lane.b32.xlu1 %v589_v12, %s1608_s3 }
 0xeb9   :  { %v592_v14 = vpop.permute.xlu1 %591 }
 0xeba   :  { %v1761_v15 = vadd.f32 %v592_v14, %v584_v13 }
 0xebc   :  { %1451 = vtanh.f32 %v1761_v15 }
 0xebd   :  { %1453 = vtanh.f32 %v734_v20 }
 0xec2   :  { %v1452_v16 = vpop.eup %1451 }
 0xec3   :  { %597 = vrot.lane.b32.xlu2 %v1452_v16, %s1607_s1  ;;  %v1454_v23 = vpop.eup %1453 }
 0xf1d   :  { %v598_v21 = vpop.permute.xlu2 %597 }
 0xf1e   :  { %v600_v22 = vmul.f32 %v598_v21, %v581_v11 }
 0xf20   :  { %602 = vrot.lane.b32.xlu0 %v600_v22, %s1608_s3 }
 0xf28   :  { %791 = vrot.lane.b32.xlu0 %v1454_v23, %s1607_s1 }
 0xf92   :  { %v603_v24 = vpop.permute.xlu0 %602 }
 0xf93   :  { %606 = vst.msk [vmem:[#allocation2 + $0x30] sm:$0xff] %vm193_vm5, %v603_v24  ;;  %1356 = vmatmul.msk.f32.vlgmr.msra.gmra.mxu1 %vm193_vm5, %v603_v24 }
 0xf94   :  { %1015 = vmatpush.msra.mxu1 %v1792_v6 }
 0xf96   :  { %1016 = vmatpush.msra.mxu1 %v1797_v7 }
 0xf98   :  { %1017 = vmatpush.msra.mxu1 %v1806_v8 }
 0xf9a   :  { %v682_v25 = vld [vmem:[#allocation2 + $0x30] sm:$0xff]  ;;  %v792_v51 = vpop.permute.xlu0 %791  ;;  %1018 = vmatpush.msra.mxu1 %v1811_v9 }
 0xf9b   :  { %1364 = vmatmul.msk.f32.vlgmr.msra.gmra.mxu3 %vm193_vm5, %v682_v25 }
 0xf9c   :  { %951 = vmatpush.msra.mxu3 %v1792_v6 }
 0xf9e   :  { %952 = vmatpush.msra.mxu3 %v1797_v7 }
 0xfa0   :  { %953 = vmatpush.msra.mxu3 %v1806_v8 }
 0xfa2   :  { %954 = vmatpush.msra.mxu3 %v1811_v9 }
0x1010   :  { %v628_v28 = vpop.f32.mrf.mxu1 }
0x1011   :  { %v631_v29 = vadd.f32 %v628_v28, %v143_v27 }
0x1013   :  { %1455 = vtanh.f32 %v631_v29  ;;  %v1357_v32 = vmul.f32 -1.442695, %v631_v29 }
0x1014   :  { %1457 = vpow2.f32 %v1366_v31 }
0x1015   :  { %1459 = vpow2.f32 %v1357_v32 }
0x1019   :  { %v1456_v30 = vpop.eup %1455 }
0x101a   :  { %654 = vrot.lane.b32.xlu1 %v1456_v30, %s1607_s1  ;;  %v1458_v33 = vpop.eup %1457 }
0x101b   :  { %v1460_v34 = vpop.eup %1459  ;;  %v773_v35 = vadd.f32 1.0, %v1458_v33 }
0x101c   :  { %v635_v36 = vadd.f32 1.0, %v1460_v34 }
0x101d   :  { %1461 = vrcp.f32 %v773_v35  ;;  %v785_v45 = vand.u32 2147483648, %v773_v35  ;;  %vm779_vm2 = vweird.f32 %v773_v35  ;;  %v783_v47 = vand.u32 2147483647, %v773_v35 }
0x101e   :  { %1463 = vrcp.f32 %v635_v36  ;;  %v647_v48 = vand.u32 2147483648, %v635_v36  ;;  %vm641_vm4 = vweird.f32 %v635_v36  ;;  %v645_v49 = vand.u32 2147483647, %v635_v36  ;;  %v1833_v13 = vpop.f32.mrf.mxu3 }
0x101f   :  { %v786_v52 = vor.u32 1.1754944e-38, %v785_v45  ;;  %vm784_vm7 = vcmp.eq.f32.partialorder %v783_v47, 8.507059e+37 }
0x1020   :  { %v648_v54 = vor.u32 1.1754944e-38, %v647_v48  ;;  %vm646_vm8 = vcmp.eq.f32.partialorder %v645_v49, 8.507059e+37 }
0x1023   :  { %v1462_v37 = vpop.eup %1461 }
0x1024   :  { %v1464_v38 = vpop.eup %1463  ;;  %v775_v39 = vmul.f32 %v1462_v37, %v773_v35  ;;  %vm780_vm0 = vweird.f32 %v1462_v37 }
0x1025   :  { %v637_v3 = vmul.f32 %v1464_v38, %v635_v36  ;;  %vm642_vm1 = vweird.f32 %v1464_v38  ;;  %vm781_vm3 = vmor %vm779_vm2, %vm780_vm0 }
0x1026   :  { %v776_v40 = vsub.f32 1.0, %v775_v39  ;;  %vm643_vm6 = vmor %vm641_vm4, %vm642_vm1 }
0x1027   :  { %v638_v41 = vsub.f32 1.0, %v637_v3 }
0x1028   :  { %v777_v42 = vmul.f32 %v1462_v37, %v776_v40 }
0x1029   :  { %v639_v43 = vmul.f32 %v1464_v38, %v638_v41 }
0x102a   :  { %v778_v44 = vadd.f32 %v1462_v37, %v777_v42 }
0x102b   :  { %v640_v46 = vadd.f32 %v1464_v38, %v639_v43 }
0x102c   :  { %v782_v50 = vsel %vm781_vm3, %v1462_v37, %v778_v44 }
0x102d   :  { %v644_v53 = vsel %vm643_vm6, %v1464_v38, %v640_v46  ;;  %v787_v55 = vsel %vm784_vm7, %v786_v52, %v782_v50 }
0x102e   :  { %v794_v56 = vmul.f32 %v792_v51, %v787_v55  ;;  %v649_v58 = vsel %vm646_vm8, %v648_v54, %v644_v53 }
0x102f   :  { %v652_v61 = vmul.f32 %v649_v58, %v1761_v15  ;;  %v736_v15 = vpop.f32.mrf.mxu2 }
0x1030   :  { %1465 = vtanh.f32 %v794_v56  ;;  %v737_v16 = vadd.f32 %v1772_v18, %v736_v15 }
0x1036   :  { %v1466_v60 = vpop.eup %1465 }
0x1037   :  { %v739_v43 = vpop.f32.mrf.mxu2 }
0x1038   :  { %v740_v44 = vadd.f32 %v1772_v18, %v739_v43 }
0x108c   :  { %v655_v57 = vpop.permute.xlu1 %654 }
0x108d   :  { %v657_v59 = vmul.f32 %v655_v57, %v649_v58 }
0x108f   :  { %659 = vrot.lane.b32.xlu2 %v657_v59, %s1608_s3 }
0x1097   :  { %797 = vrot.lane.b32.xlu2 %v1466_v60, %s1609_s27 }
0x10e9   :  { %v660_v62 = vpop.permute.xlu2 %659 }
0x10ea   :  { %v662_v63 = vadd.f32 %v660_v62, %v652_v61 }
0x10ec   :  { %1467 = vtanh.f32 %v662_v63 }
0x10f1   :  { %v798_v1 = vpop.permute.xlu2 %797 }
0x10f2   :  { %v1468_v0 = vpop.eup %1467  ;;  %v800_v2 = vmul.f32 %v798_v1, %v787_v55 }
0x10f3   :  { %665 = vrot.lane.b32.xlu1 %v1468_v0, %s1607_s1 }
0x10fb   :  { %803 = vrot.lane.b32.xlu1 %v800_v2, %s1608_s3 }
0x1165   :  { %v666_v4 = vpop.permute.xlu1 %665 }
0x1166   :  { %v668_v5 = vmul.f32 %v666_v4, %v649_v58 }
0x1168   :  { %670 = vrot.lane.b32.xlu0 %v668_v5, %s1608_s3 }
0x116d   :  { %v804_v12 = vpop.permute.xlu1 %803 }
0x1170   :  { %849 = vrot.lane.b32.xlu0 %v794_v56, %s1608_s3 }
0x11da   :  { %v671_v10 = vpop.permute.xlu0 %670 }
0x11db   :  { %674 = vst.msk [vmem:[#allocation2 + $0x38] sm:$0xff] %vm193_vm5, %v671_v10 }
0x11dc   :  { %675 = vst.msk [vmem:[#allocation5] sm:$0xff] %vm193_vm5, %v671_v10 }
0x11e2   :  { %v683_v11 = vld [vmem:[#allocation2 + $0x38] sm:$0xff]  ;;  %v850_v36 = vpop.permute.xlu0 %849 }
0x11e3   :  { %1365 = vmatmul.msk.f32.gmra.mxu3 %vm193_vm5, %v683_v11  ;;  %v742_v11 = vpop.f32.mrf.mxu2 }
0x11eb   :  { %1367 = vmatmul.msk.f32.vlgmr.msrb.gmra.mxu3 %vm193_vm5, %v804_v12  ;;  %v743_v12 = vadd.f32 %v1772_v18, %v742_v11 }
0x11ec   :  { %1079 = vmatpush.msrb.mxu3 %v1792_v6 }
0x11ee   :  { %1080 = vmatpush.msrb.mxu3 %v1797_v7 }
0x11f0   :  { %1081 = vmatpush.msrb.mxu3 %v1806_v8 }
0x11f2   :  { %1082 = vmatpush.msrb.mxu3 %v1811_v9 }
0x1266   :  { %v1835_v14 = vpop.f32.mrf.mxu3 }
0x126e   :  { %v824_v17 = vpop.f32.mrf.mxu3 }
0x126f   :  { %v827_v19 = vadd.f32 %v824_v17, %v737_v16 }
0x1271   :  { %1469 = vtanh.f32 %v827_v19  ;;  %v1368_v21 = vmul.f32 -1.442695, %v827_v19 }
0x1273   :  { %1471 = vpow2.f32 %v1368_v21 }
0x1277   :  { %v1470_v20 = vpop.eup %1469 }
0x1278   :  { %854 = vrot.lane.b32.xlu2 %v1470_v20, %s1607_s1 }
0x1279   :  { %v1472_v22 = vpop.eup %1471 }
0x127a   :  { %v831_v23 = vadd.f32 1.0, %v1472_v22 }
0x127c   :  { %1473 = vrcp.f32 %v831_v23  ;;  %v843_v29 = vand.u32 2147483648, %v831_v23  ;;  %vm837_vm10 = vweird.f32 %v831_v23  ;;  %v841_v30 = vand.u32 2147483647, %v831_v23 }
0x127e   :  { %v844_v32 = vor.u32 1.1754944e-38, %v843_v29  ;;  %vm842_vm12 = vcmp.eq.f32.partialorder %v841_v30, 8.507059e+37 }
0x1282   :  { %v1474_v24 = vpop.eup %1473 }
0x1283   :  { %v833_v25 = vmul.f32 %v1474_v24, %v831_v23  ;;  %vm838_vm9 = vweird.f32 %v1474_v24 }
0x1284   :  { %vm839_vm11 = vmor %vm837_vm10, %vm838_vm9 }
0x1285   :  { %v834_v26 = vsub.f32 1.0, %v833_v25 }
0x1287   :  { %v835_v27 = vmul.f32 %v1474_v24, %v834_v26 }
0x1289   :  { %v836_v28 = vadd.f32 %v1474_v24, %v835_v27 }
0x128b   :  { %v840_v31 = vsel %vm839_vm11, %v1474_v24, %v836_v28 }
0x128c   :  { %v845_v34 = vsel %vm842_vm12, %v844_v32, %v840_v31 }
0x128d   :  { %v852_v37 = vmul.f32 %v850_v36, %v845_v34 }
0x12d2   :  { %v855_v33 = vpop.permute.xlu2 %854 }
0x12d3   :  { %v857_v35 = vmul.f32 %v855_v33, %v845_v34 }
0x12d5   :  { %859 = vrot.lane.b32.xlu1 %v857_v35, %s1608_s3 }
0x1347   :  { %v860_v38 = vpop.permute.xlu1 %859 }
0x1348   :  { %v862_v39 = vadd.f32 %v860_v38, %v852_v37  ;;  %v745_v37 = vpop.f32.mrf.mxu2 }
0x1349   :  { %v746_v38 = vadd.f32 %v1772_v18, %v745_v37 }
0x134a   :  { %1475 = vtanh.f32 %v862_v39 }
0x1350   :  { %v1476_v3 = vpop.eup %1475 }
0x1351   :  { %865 = vrot.lane.b32.xlu2 %v1476_v3, %s1607_s1 }
0x13ab   :  { %v866_v40 = vpop.permute.xlu2 %865 }
0x13ac   :  { %v868_v41 = vmul.f32 %v866_v40, %v845_v34 }
0x13ae   :  { %871 = vrot.lane.b32.xlu0 %v868_v41, %s1608_s3 }
0x1420   :  { %v872_v42 = vpop.permute.xlu0 %871 }
0x1421   :  { %1369 = vmatmul.msk.f32.vlgmr.msrb.gmra.mxu1 %vm193_vm5, %v872_v42 }
0x1422   :  { %1143 = vmatpush.msrb.mxu1 %v1792_v6 }
0x1424   :  { %1144 = vmatpush.msrb.mxu1 %v1797_v7 }
0x1426   :  { %1145 = vmatpush.msrb.mxu1 %v1806_v8 }
0x1428   :  { %1146 = vmatpush.msrb.mxu1 %v1811_v9 }
0x149e   :  { %v892_v45 = vpop.f32.mrf.mxu1 }
0x149f   :  { %v895_v46 = vadd.f32 %v892_v45, %v740_v44 }
0x14a1   :  { %1477 = vtanh.f32 %v895_v46  ;;  %v1370_v48 = vmul.f32 -1.442695, %v895_v46 }
0x14a3   :  { %1479 = vpow2.f32 %v1370_v48 }
0x14a7   :  { %v1478_v47 = vpop.eup %1477 }
0x14a8   :  { %918 = vrot.lane.b32.xlu1 %v1478_v47, %s1607_s1 }
0x14a9   :  { %v1480_v49 = vpop.eup %1479 }
0x14aa   :  { %v899_v50 = vadd.f32 1.0, %v1480_v49 }
0x14ac   :  { %1481 = vrcp.f32 %v899_v50  ;;  %v911_v56 = vand.u32 2147483648, %v899_v50  ;;  %vm905_vm14 = vweird.f32 %v899_v50  ;;  %v909_v57 = vand.u32 2147483647, %v899_v50 }
0x14ae   :  { %v912_v59 = vor.u32 1.1754944e-38, %v911_v56  ;;  %vm910_vm0 = vcmp.eq.f32.partialorder %v909_v57, 8.507059e+37 }
0x14b2   :  { %v1482_v51 = vpop.eup %1481 }
0x14b3   :  { %v901_v52 = vmul.f32 %v1482_v51, %v899_v50  ;;  %vm906_vm13 = vweird.f32 %v1482_v51 }
0x14b4   :  { %vm907_vm15 = vmor %vm905_vm14, %vm906_vm13 }
0x14b5   :  { %v902_v53 = vsub.f32 1.0, %v901_v52 }
0x14b7   :  { %v903_v54 = vmul.f32 %v1482_v51, %v902_v53 }
0x14b9   :  { %v904_v55 = vadd.f32 %v1482_v51, %v903_v54 }
0x14bb   :  { %v908_v58 = vsel %vm907_vm15, %v1482_v51, %v904_v55 }
0x14bc   :  { %v913_v61 = vsel %vm910_vm0, %v912_v59, %v908_v58 }
0x14bd   :  { %v916_v63 = vmul.f32 %v913_v61, %v862_v39 }
0x151a   :  { %v919_v60 = vpop.permute.xlu1 %918 }
0x151b   :  { %v921_v62 = vmul.f32 %v919_v60, %v913_v61 }
0x151d   :  { %923 = vrot.lane.b32.xlu2 %v921_v62, %s1608_s3 }
0x1577   :  { %v924_v0 = vpop.permute.xlu2 %923 }
0x1578   :  { %v926_v1 = vadd.f32 %v924_v0, %v916_v63  ;;  %v748_v63 = vpop.f32.mrf.mxu2 }
0x1579   :  { %v749_v0 = vadd.f32 %v1772_v18, %v748_v63 }
0x157a   :  { %1483 = vtanh.f32 %v926_v1 }
0x1580   :  { %v1484_v2 = vpop.eup %1483 }
0x1581   :  { %929 = vrot.lane.b32.xlu0 %v1484_v2, %s1607_s1 }
0x15f3   :  { %v930_v4 = vpop.permute.xlu0 %929 }
0x15f4   :  { %v932_v5 = vmul.f32 %v930_v4, %v913_v61 }
0x15f6   :  { %935 = vrot.lane.b32.xlu1 %v932_v5, %s1608_s3 }
0x1668   :  { %v936_v10 = vpop.permute.xlu1 %935 }
0x1669   :  { %1371 = vmatmul.msk.f32.vlgmr.msra.gmra.mxu3 %vm193_vm5, %v936_v10 }
0x166a   :  { %1207 = vmatpush.msra.mxu3 %v1792_v6 }
0x166c   :  { %1208 = vmatpush.msra.mxu3 %v1797_v7 }
0x166e   :  { %1209 = vmatpush.msra.mxu3 %v1806_v8 }
0x1670   :  { %1210 = vmatpush.msra.mxu3 %v1811_v9 }
0x16ec   :  { %v956_v15 = vpop.f32.mrf.mxu3 }
0x16ed   :  { %v959_v16 = vadd.f32 %v956_v15, %v743_v12 }
0x16ef   :  { %1485 = vtanh.f32 %v959_v16  ;;  %v1372_v19 = vmul.f32 -1.442695, %v959_v16 }
0x16f1   :  { %1487 = vpow2.f32 %v1372_v19 }
0x16f5   :  { %v1486_v17 = vpop.eup %1485 }
0x16f6   :  { %982 = vrot.lane.b32.xlu2 %v1486_v17, %s1607_s1 }
0x16f7   :  { %v1488_v20 = vpop.eup %1487 }
0x16f8   :  { %v963_v21 = vadd.f32 1.0, %v1488_v20 }
0x16fa   :  { %1489 = vrcp.f32 %v963_v21  ;;  %v975_v9 = vand.u32 2147483648, %v963_v21  ;;  %vm969_vm2 = vweird.f32 %v963_v21  ;;  %v973_v24 = vand.u32 2147483647, %v963_v21 }
0x16fc   :  { %v976_v26 = vor.u32 1.1754944e-38, %v975_v9  ;;  %vm974_vm4 = vcmp.eq.f32.partialorder %v973_v24, 8.507059e+37 }
0x1700   :  { %v1490_v6 = vpop.eup %1489 }
0x1701   :  { %v965_v7 = vmul.f32 %v1490_v6, %v963_v21  ;;  %vm970_vm1 = vweird.f32 %v1490_v6 }
0x1702   :  { %vm971_vm3 = vmor %vm969_vm2, %vm970_vm1 }
0x1703   :  { %v966_v22 = vsub.f32 1.0, %v965_v7 }
0x1705   :  { %v967_v8 = vmul.f32 %v1490_v6, %v966_v22 }
0x1707   :  { %v968_v23 = vadd.f32 %v1490_v6, %v967_v8 }
0x1709   :  { %v972_v25 = vsel %vm971_vm3, %v1490_v6, %v968_v23 }
0x170a   :  { %v977_v28 = vsel %vm974_vm4, %v976_v26, %v972_v25 }
0x170b   :  { %v980_v30 = vmul.f32 %v977_v28, %v926_v1 }
0x1750   :  { %v983_v27 = vpop.permute.xlu2 %982 }
0x1751   :  { %v985_v29 = vmul.f32 %v983_v27, %v977_v28 }
0x1753   :  { %987 = vrot.lane.b32.xlu0 %v985_v29, %s1608_s3 }
0x17c5   :  { %v988_v31 = vpop.permute.xlu0 %987 }
0x17c6   :  { %v990_v32 = vadd.f32 %v988_v31, %v980_v30  ;;  %v752_v30 = vadd.f32 %v1772_v18, %v1833_v13 }
0x17c8   :  { %1491 = vtanh.f32 %v990_v32 }
0x17ce   :  { %v1492_v33 = vpop.eup %1491 }
0x17cf   :  { %993 = vrot.lane.b32.xlu1 %v1492_v33, %s1607_s1 }
0x1841   :  { %v994_v34 = vpop.permute.xlu1 %993 }
0x1842   :  { %v996_v35 = vmul.f32 %v994_v34, %v977_v28 }
0x1844   :  { %999 = vrot.lane.b32.xlu2 %v996_v35, %s1608_s3 }
0x189e   :  { %v1000_v36 = vpop.permute.xlu2 %999 }
0x189f   :  { %1373 = vmatmul.msk.f32.vlgmr.msra.gmra.mxu1 %vm193_vm5, %v1000_v36 }
0x191c   :  { %v1020_v39 = vpop.f32.mrf.mxu1 }
0x191d   :  { %v1023_v3 = vadd.f32 %v1020_v39, %v746_v38 }
0x191f   :  { %1493 = vtanh.f32 %v1023_v3  ;;  %v1374_v41 = vmul.f32 -1.442695, %v1023_v3 }
0x1921   :  { %1495 = vpow2.f32 %v1374_v41 }
0x1925   :  { %v1494_v40 = vpop.eup %1493 }
0x1926   :  { %1046 = vrot.lane.b32.xlu0 %v1494_v40, %s1607_s1 }
0x1927   :  { %v1496_v42 = vpop.eup %1495 }
0x1928   :  { %v1027_v43 = vadd.f32 1.0, %v1496_v42 }
0x192a   :  { %1497 = vrcp.f32 %v1027_v43  ;;  %v1039_v49 = vand.u32 2147483648, %v1027_v43  ;;  %vm1033_vm7 = vweird.f32 %v1027_v43  ;;  %v1037_v50 = vand.u32 2147483647, %v1027_v43 }
0x192c   :  { %v1040_v52 = vor.u32 1.1754944e-38, %v1039_v49  ;;  %vm1038_vm9 = vcmp.eq.f32.partialorder %v1037_v50, 8.507059e+37 }
0x1930   :  { %v1498_v44 = vpop.eup %1497 }
0x1931   :  { %v1029_v45 = vmul.f32 %v1498_v44, %v1027_v43  ;;  %vm1034_vm6 = vweird.f32 %v1498_v44 }
0x1932   :  { %vm1035_vm8 = vmor %vm1033_vm7, %vm1034_vm6  ;;  %vm1276_vm7 = vcmask 1040384  }
0x1933   :  { %v1030_v46 = vsub.f32 1.0, %v1029_v45 }
0x1935   :  { %v1031_v47 = vmul.f32 %v1498_v44, %v1030_v46 }
0x1937   :  { %v1032_v48 = vadd.f32 %v1498_v44, %v1031_v47 }
0x1939   :  { %v1036_v51 = vsel %vm1035_vm8, %v1498_v44, %v1032_v48  ;;  %vm1291_vm8 = vcmask 523264  }
0x193a   :  { %v1041_v54 = vsel %vm1038_vm9, %v1040_v52, %v1036_v51  ;;  %vm1315_vm9 = vcmask 25600  }
0x193b   :  { %v1044_v56 = vmul.f32 %v1041_v54, %v990_v32 }
0x1998   :  { %v1047_v53 = vpop.permute.xlu0 %1046 }
0x1999   :  { %v1049_v55 = vmul.f32 %v1047_v53, %v1041_v54 }
0x199b   :  { %1051 = vrot.lane.b32.xlu1 %v1049_v55, %s1608_s3 }
0x1a0d   :  { %v1052_v57 = vpop.permute.xlu1 %1051 }
0x1a0e   :  { %v1054_v58 = vadd.f32 %v1052_v57, %v1044_v56 }
0x1a10   :  { %1499 = vtanh.f32 %v1054_v58 }
0x1a16   :  { %v1500_v59 = vpop.eup %1499 }
0x1a17   :  { %1057 = vrot.lane.b32.xlu2 %v1500_v59, %s1607_s1 }
0x1a71   :  { %v1058_v60 = vpop.permute.xlu2 %1057 }
0x1a72   :  { %v1060_v61 = vmul.f32 %v1058_v60, %v1041_v54  ;;  %v755_v54 = vadd.f32 %v1772_v18, %v1835_v14 }
0x1a74   :  { %1063 = vrot.lane.b32.xlu0 %v1060_v61, %s1608_s3 }
0x1ae6   :  { %v1064_v62 = vpop.permute.xlu0 %1063 }
0x1ae7   :  { %1375 = vmatmul.msk.f32.vlgmr.msrb.gmra.mxu3 %vm193_vm5, %v1064_v62 }
0x1b6a   :  { %v1084_v1 = vpop.f32.mrf.mxu3 }
0x1b6b   :  { %v1087_v2 = vadd.f32 %v1084_v1, %v749_v0 }
0x1b6d   :  { %1501 = vtanh.f32 %v1087_v2  ;;  %v1376_v5 = vmul.f32 -1.442695, %v1087_v2 }
0x1b6f   :  { %1503 = vpow2.f32 %v1376_v5 }
0x1b73   :  { %v1502_v4 = vpop.eup %1501 }
0x1b74   :  { %1110 = vrot.lane.b32.xlu1 %v1502_v4, %s1607_s1 }
0x1b75   :  { %v1504_v10 = vpop.eup %1503 }
0x1b76   :  { %v1091_v11 = vadd.f32 1.0, %v1504_v10 }
0x1b78   :  { %1505 = vrcp.f32 %v1091_v11  ;;  %v1103_v20 = vand.u32 2147483648, %v1091_v11  ;;  %vm1097_vm11 = vweird.f32 %v1091_v11  ;;  %v1101_v21 = vand.u32 2147483647, %v1091_v11 }
0x1b7a   :  { %v1104_v7 = vor.u32 1.1754944e-38, %v1103_v20  ;;  %vm1102_vm13 = vcmp.eq.f32.partialorder %v1101_v21, 8.507059e+37 }
0x1b7e   :  { %v1506_v12 = vpop.eup %1505 }
0x1b7f   :  { %v1093_v15 = vmul.f32 %v1506_v12, %v1091_v11  ;;  %vm1098_vm10 = vweird.f32 %v1506_v12 }
0x1b80   :  { %vm1099_vm12 = vmor %vm1097_vm11, %vm1098_vm10 }
0x1b81   :  { %v1094_v16 = vsub.f32 1.0, %v1093_v15 }
0x1b83   :  { %v1095_v17 = vmul.f32 %v1506_v12, %v1094_v16 }
0x1b85   :  { %v1096_v19 = vadd.f32 %v1506_v12, %v1095_v17 }
0x1b87   :  { %v1100_v6 = vsel %vm1099_vm12, %v1506_v12, %v1096_v19  ;;  %v1259_v19 = vld [vmem:[#allocation5] sm:$0xff] }
0x1b88   :  { %v1105_v8 = vsel %vm1102_vm13, %v1104_v7, %v1100_v6  ;;  %v1262_v20 = vrot.slane %v1259_v19, 1  ;;  %v1286_v7 = vld [vmem:[%s1930_s7 + $0x38] sm:$0xff] }
0x1b89   :  { %v1108_v9 = vmul.f32 %v1105_v8, %v1054_v58  ;;  %1303 = vmatpush.msra.mxu1 %v1286_v7 }
0x1be6   :  { %v1111_v22 = vpop.permute.xlu1 %1110 }
0x1be7   :  { %v1113_v23 = vmul.f32 %v1111_v22, %v1105_v8  ;;  %v1285_v22 = vld [vmem:[%s1930_s7 + $0x30] sm:$0xff] }
0x1be8   :  { %1304 = vmatpush.msra.mxu1 %v1285_v22 }
0x1be9   :  { %1115 = vrot.lane.b32.xlu2 %v1113_v23, %s1608_s3  ;;  %v1283_v23 = vld [vmem:[%s1930_s7 + $0x20] sm:$0xff] }
0x1c43   :  { %v1116_v24 = vpop.permute.xlu2 %1115 }
0x1c44   :  { %v1118_v25 = vadd.f32 %v1116_v24, %v1108_v9  ;;  %v1282_v9 = vld [vmem:[%s1930_s7 + $0x18] sm:$0xff] }
0x1c46   :  { %1507 = vtanh.f32 %v1118_v25 }
0x1c4c   :  { %v1508_v26 = vpop.eup %1507 }
0x1c4d   :  { %1121 = vrot.lane.b32.xlu0 %v1508_v26, %s1607_s1 }
0x1cbf   :  { %v1122_v27 = vpop.permute.xlu0 %1121 }
0x1cc0   :  { %v1124_v28 = vmul.f32 %v1122_v27, %v1105_v8  ;;  %v1284_v8 = vld [vmem:[%s1930_s7 + $0x28] sm:$0xff]  ;;  %v1281_v27 = vld [vmem:[%s1930_s7 + $0x10] sm:$0xff] }
0x1cc1   :  { %1305 = vmatpush.msra.mxu1 %v1284_v8 }
0x1cc2   :  { %1127 = vrot.lane.b32.xlu1 %v1124_v28, %s1608_s3  ;;  %v1280_v28 = vld [vmem:[%s1930_s7 + $0x8] sm:$0xff] }
0x1cc3   :  { %1306 = vmatpush.msra.mxu1 %v1283_v23 }
0x1cc5   :  { %1307 = vmatpush.msra.mxu1 %v1282_v9 }
0x1cc7   :  { %1308 = vmatpush.msra.mxu1 %v1281_v27 }
0x1cc9   :  { %1309 = vmatpush.msra.mxu1 %v1280_v28 }
0x1d34   :  { %v1128_v29 = vpop.permute.xlu1 %1127 }
0x1d35   :  { %1377 = vmatmul.msk.f32.vlgmr.msrb.gmra.mxu1 %vm193_vm5, %v1128_v29  ;;  %v1279_v29 = vld [vmem:[%s1930_s7] sm:$0xff] }
0x1d36   :  { %1310 = vmatpush.msra.mxu1 %v1279_v29 }
0x1db2   :  { %v1148_v31 = vpop.f32.mrf.mxu1 }
0x1db3   :  { %v1151_v32 = vadd.f32 %v1148_v31, %v752_v30 }
0x1db5   :  { %1509 = vtanh.f32 %v1151_v32  ;;  %v1378_v34 = vmul.f32 -1.442695, %v1151_v32 }
0x1db7   :  { %1511 = vpow2.f32 %v1378_v34 }
0x1dbb   :  { %v1510_v33 = vpop.eup %1509 }
0x1dbc   :  { %1174 = vrot.lane.b32.xlu2 %v1510_v33, %s1607_s1 }
0x1dbd   :  { %v1512_v35 = vpop.eup %1511 }
0x1dbe   :  { %v1155_v36 = vadd.f32 1.0, %v1512_v35 }
0x1dc0   :  { %1513 = vrcp.f32 %v1155_v36  ;;  %v1167_v41 = vand.u32 2147483648, %v1155_v36  ;;  %vm1161_vm15 = vweird.f32 %v1155_v36  ;;  %v1165_v13 = vand.u32 2147483647, %v1155_v36 }
0x1dc2   :  { %v1168_v43 = vor.u32 1.1754944e-38, %v1167_v41  ;;  %vm1166_vm1 = vcmp.eq.f32.partialorder %v1165_v13, 8.507059e+37 }
0x1dc6   :  { %v1514_v37 = vpop.eup %1513 }
0x1dc7   :  { %v1157_v38 = vmul.f32 %v1514_v37, %v1155_v36  ;;  %vm1162_vm14 = vweird.f32 %v1514_v37 }
0x1dc8   :  { %vm1163_vm0 = vmor %vm1161_vm15, %vm1162_vm14 }
0x1dc9   :  { %v1158_v39 = vsub.f32 1.0, %v1157_v38 }
0x1dcb   :  { %v1159_v3 = vmul.f32 %v1514_v37, %v1158_v39 }
0x1dcd   :  { %v1160_v40 = vadd.f32 %v1514_v37, %v1159_v3 }
0x1dcf   :  { %v1164_v42 = vsel %vm1163_vm0, %v1514_v37, %v1160_v40  ;;  %v1396_v37 = vld [vmem:[%s1931_s8] ss:$0 sm:$0xff] }
0x1dd0   :  { %v1169_v45 = vsel %vm1166_vm1, %v1168_v43, %v1164_v42 }
0x1dd1   :  { %v1172_v47 = vmul.f32 %v1169_v45, %v1118_v25 }
0x1e16   :  { %v1175_v44 = vpop.permute.xlu2 %1174 }
0x1e17   :  { %v1177_v46 = vmul.f32 %v1175_v44, %v1169_v45 }
0x1e19   :  { %1179 = vrot.lane.b32.xlu0 %v1177_v46, %s1608_s3 }
0x1e8b   :  { %v1180_v48 = vpop.permute.xlu0 %1179 }
0x1e8c   :  { %v1182_v49 = vadd.f32 %v1180_v48, %v1172_v47 }
0x1e8e   :  { %1515 = vtanh.f32 %v1182_v49 }
0x1e94   :  { %v1516_v50 = vpop.eup %1515 }
0x1e95   :  { %1185 = vrot.lane.b32.xlu1 %v1516_v50, %s1607_s1 }
0x1f07   :  { %v1186_v51 = vpop.permute.xlu1 %1185 }
0x1f08   :  { %v1188_v52 = vmul.f32 %v1186_v51, %v1169_v45 }
0x1f0a   :  { %1191 = vrot.lane.b32.xlu2 %v1188_v52, %s1608_s3 }
0x1f64   :  { %v1192_v53 = vpop.permute.xlu2 %1191 }
0x1f65   :  { %1379 = vmatmul.msk.f32.vlgmr.msra.gmra.mxu3 %vm193_vm5, %v1192_v53 }
0x1fe8   :  { %v1212_v55 = vpop.f32.mrf.mxu3 }
0x1fe9   :  { %v1215_v56 = vadd.f32 %v1212_v55, %v755_v54 }
0x1feb   :  { %1517 = vtanh.f32 %v1215_v56  ;;  %v1380_v58 = vmul.f32 -1.442695, %v1215_v56 }
0x1fed   :  { %1519 = vpow2.f32 %v1380_v58 }
0x1ff1   :  { %v1518_v57 = vpop.eup %1517 }
0x1ff2   :  { %1238 = vrot.lane.b32.xlu0 %v1518_v57, %s1607_s1 }
0x1ff3   :  { %v1520_v59 = vpop.eup %1519 }
0x1ff4   :  { %v1219_v60 = vadd.f32 1.0, %v1520_v59 }
0x1ff6   :  { %1521 = vrcp.f32 %v1219_v60  ;;  %v1231_v2 = vand.u32 2147483648, %v1219_v60  ;;  %vm1225_vm3 = vweird.f32 %v1219_v60  ;;  %v1229_v18 = vand.u32 2147483647, %v1219_v60 }
0x1ff8   :  { %v1232_v4 = vor.u32 1.1754944e-38, %v1231_v2  ;;  %vm1230_vm6 = vcmp.eq.f32.partialorder %v1229_v18, 8.507059e+37 }
0x1ffc   :  { %v1522_v61 = vpop.eup %1521 }
0x1ffd   :  { %v1221_v62 = vmul.f32 %v1522_v61, %v1219_v60  ;;  %vm1226_vm2 = vweird.f32 %v1522_v61 }
0x1ffe   :  { %vm1227_vm4 = vmor %vm1225_vm3, %vm1226_vm2 }
0x1fff   :  { %v1222_v63 = vsub.f32 1.0, %v1221_v62 }
0x2001   :  { %v1223_v0 = vmul.f32 %v1522_v61, %v1222_v63 }
0x2003   :  { %v1224_v1 = vadd.f32 %v1522_v61, %v1223_v0 }
0x2005   :  { %v1228_v14 = vsel %vm1227_vm4, %v1522_v61, %v1224_v1 }
0x2006   :  { %v1233_v10 = vsel %vm1230_vm6, %v1232_v4, %v1228_v14 }
0x2007   :  { %v1236_v12 = vmul.f32 %v1233_v10, %v1182_v49 }
0x2064   :  { %v1239_v5 = vpop.permute.xlu0 %1238 }
0x2065   :  { %v1241_v11 = vmul.f32 %v1239_v5, %v1233_v10 }
0x2067   :  { %1243 = vrot.lane.b32.xlu1 %v1241_v11, %s1608_s3 }
0x20d9   :  { %v1244_v15 = vpop.permute.xlu1 %1243 }
0x20da   :  { %v1246_v16 = vadd.f32 %v1244_v15, %v1236_v12 }
0x20dc   :  { %1523 = vtanh.f32 %v1246_v16 }
0x20e2   :  { %v1524_v17 = vpop.eup %1523 }
0x20e3   :  { %1249 = vrot.lane.b32.xlu2 %v1524_v17, %s1607_s1 }
0x20eb   :  { %1263 = vrot.lane.b32.xlu2 %v1262_v20, %s1608_s3 }
0x213d   :  { %v1250_v21 = vpop.permute.xlu2 %1249 }
0x213e   :  { %v1252_v6 = vmul.f32 %v1250_v21, %v1233_v10 }
0x2140   :  { %1254 = vrot.lane.b32.xlu0 %v1252_v6, %s1608_s3 }
0x2145   :  { %v1264_v30 = vpop.permute.xlu2 %1263 }
0x2146   :  { %v1266_v34 = vsel %vm193_vm5, %v1259_v19, %v1264_v30 }
0x21b2   :  { %v1255_v24 = vpop.permute.xlu0 %1254 }
0x21b3   :  { %1258 = vst.msk [vmem:[#allocation5 + $0x8] sm:$0xff] %vm193_vm5, %v1255_v24 }
0x21ba   :  { %v1260_v25 = vld [vmem:[#allocation5 + $0x8] sm:$0xff] }
0x21bb   :  { %v1268_v26 = vrot.slane %v1260_v25, 1 }
0x21bd   :  { %1269 = vrot.lane.b32.xlu1 %v1268_v26, %s1608_s3 }
0x222f   :  { %v1270_v31 = vpop.permute.xlu1 %1269 }
0x2230   :  { %v1272_v32 = vsel %vm193_vm5, %v1260_v25, %v1270_v31 }
0x2231   :  { %v1274_v33 = vrot.slane %v1272_v32, 7 }
0x2233   :  { %v1277_v35 = vsel %vm1276_vm7, %v1266_v34, %v1274_v33 }
0x2234   :  { %v1278_v36 = vmax.f32 %v1277_v35, 0.0 }
0x2236   :  { %1381 = vmatmul.msk.f32.vlgmr.msra.gmra.mxu1 %vm1291_vm8, %v1278_v36 }
0x22b3   :  { %v1312_v38 = vpop.f32.mrf.mxu1 }
0x22b4   :  { %v1313_v39 = vadd.f32 %v1396_v37, %v1312_v38 }
0x22b6   :  { %1316 = vst.msk [vmem:[#allocation11] sm:$0x3] %vm1315_vm9, %v1313_v39 }
0x22b7   :  { %1327 = dma.vmem_to_hbm [thread:$0]  %s1323_s21, 32, %s1325_s6, [#allocation8]  }
0x22b8   :  { %1601 = dma.done.wait [#allocation8], 32  }
0x22b9   :  { %1602 = vsyncadd [#allocation8], 4294967264 }
0x22ba   :  { %1332 = vsyncpa [#allocation7], 1 }
0x22bb   :  { %1333 = vsyncpa [#allocation10], 1 }
0x22bc   :  { %1334 = vsyncpa [#allocation8], 1 }

</bundles_post_ra>
